<compile_context>
chip_gen: v7x
topology: tpu7x:2x2x1
jax: 0.10.0
libtpu: 0.0.40
codegen_flags: <defaults>
</compile_context>

<pallas_src>
import math
import functools

import jax
import jax.numpy as jnp
import numpy as np
from jax import lax
from jax.experimental import pallas as pl
from jax.experimental.pallas import tpu as pltpu

C = 11                      # fixed by the module: Conv1d(22, 11, 1); heads sum to 11
HEADS = (3, 2, 1, 3, 2)


# -----------------------------------------------------------------------------
# Glue: gather peak features.  Gather first (cheap), transpose the tiny result.
# -----------------------------------------------------------------------------
def _gather_peak_feats(feat, ind):
    # feat: (B, C, H, W), ind: (B, M) int32 indices into H*W  ->  (B, M, C)
    B, Cc, H, W = feat.shape
    flat = feat.reshape(B, Cc, H * W)
    picked = jnp.take_along_axis(flat, ind[:, None, :], axis=2)   # (B, C, M)
    return jnp.transpose(picked, (0, 2, 1))


# -----------------------------------------------------------------------------
# Pallas kernel: one grid step processes Bb batches packed into the lane axis.
#   s_ref, t_ref   : (M, P)  masked student / teacher peaks, P = Bb * 11 lanes
#   w1_ref, w2_ref : (P, P)  block-diagonal Conv1d weights (channel / head part)
#   chm_ref,hdm_ref: (P, P)  additive softmax masks (0 in-block, -1e30 off-block)
#   out_ref        : (1, 1)  partial sum of |student_proj - teacher_proj|
# -----------------------------------------------------------------------------
def attention_loss_kernel(s_ref, t_ref, w1_ref, w2_ref, chm_ref, hdm_ref,
                          out_ref, *, scale):
    w1 = w1_ref[...]
    w2 = w2_ref[...]
    chm = chm_ref[...]
    hdm = hdm_ref[...]

    def col_softmax(sc):
        # softmax over dim=-2 (rows), per column; masked rows contribute 0.
        m = jnp.max(sc, axis=0, keepdims=True)
        e = jnp.exp(sc - m)
        d = jnp.sum(e, axis=0, keepdims=True)
        return e * pl.reciprocal(d, approx=True)      # EUP slot, off the VALU

    def branch(x):
        # Full packed score: the per-batch 11x11 scores are its diagonal blocks,
        # and the per-head scores are sub-blocks of those — computed once.
        score = lax.dot_general(x, x, (((0,), (0,)), ((), ())),
                                preferred_element_type=jnp.float32) * scale
        ch_prob = col_softmax(score + chm)            # per-batch channel attn
        hd_prob = col_softmax(score + hdm)            # per-head sub-block attn
        channel = jnp.dot(x, ch_prob, preferred_element_type=jnp.float32)
        head = jnp.dot(x, hd_prob, preferred_element_type=jnp.float32)
        return channel, head

    ch_s, hd_s = branch(s_ref[...])
    ch_t, hd_t = branch(t_ref[...])

    # Conv1d(22, 11, 1) of (student - teacher): the bias cancels and the
    # projection is linear, so project the difference once (exact).
    diff = (jnp.dot(ch_s - ch_t, w1, preferred_element_type=jnp.float32)
            + jnp.dot(hd_s - hd_t, w2, preferred_element_type=jnp.float32))
    out_ref[...] = jnp.sum(jnp.abs(diff), axis=(0, 1), keepdims=True)


# -----------------------------------------------------------------------------
# Wrapper
# -----------------------------------------------------------------------------
@jax.jit
def attention_loss(out, target, mask, ind, conv_w, conv_b):
    # conv_b is accepted for API parity with the PyTorch module; the bias
    # cancels exactly in |student - teacher| and never reaches the kernel.
    del conv_b
    B, Cc, H, W = out.shape
    assert Cc == C
    M = mask.shape[1]

    mask_f = mask.astype(jnp.float32)
    s = _gather_peak_feats(out, ind) * mask_f[:, :, None]        # (B, M, 11)
    t = _gather_peak_feats(target, ind) * mask_f[:, :, None]     # (B, M, 11)

    # ---- lane packing: Bb batches -> P = Bb*11 lanes (<= 121 of 128) --------
    Bb = max(1, min(B, 128 // C))
    G = -(-B // Bb)                    # ceil(B / Bb)
    P = Bb * C
    pad = G * Bb - B

    def pack(x):                                      # (B, M, 11) -> (G, M, P)
        x = jnp.pad(x, ((0, pad), (0, 0), (0, 0)))    # zero batches are inert
        return (x.reshape(G, Bb, M, C)
                 .transpose(0, 2, 1, 3)
                 .reshape(G, M, P))

    s_p = pack(s)
    t_p = pack(t)

    # ---- block-diagonal projection weights & softmax masks ------------------
    wT = jnp.transpose(conv_w[:, :, 0], (1, 0)).astype(jnp.float32)   # (22, 11)
    eye = jnp.eye(Bb, dtype=jnp.float32)
    w1blk = jnp.kron(eye, wT[:C, :])                  # (P, P) channel-attn part
    w2blk = jnp.kron(eye, wT[C:, :])                  # (P, P) head-attn part

    head_id = np.repeat(np.arange(len(HEADS)), HEADS)         # channel -> head id
    batch_id = np.repeat(np.arange(Bb), C)                    # (P,)
    head_full = np.tile(head_id, Bb)                          # (P,)
    same_batch = batch_id[:, None] == batch_id[None, :]
    same_head = same_batch & (head_full[:, None] == head_full[None, :])
    NEG = np.float32(-1e30)
    ch_mask = jnp.asarray(np.where(same_batch, np.float32(0.0), NEG))
    hd_mask = jnp.asarray(np.where(same_head, np.float32(0.0), NEG))

    kernel = functools.partial(attention_loss_kernel,
                               scale=1.0 / math.sqrt(float(M)))

    loss_parts = pl.pallas_call(
        kernel,
        out_shape=jax.ShapeDtypeStruct((G, 1, 1), jnp.float32),
        grid_spec=pltpu.PrefetchScalarGridSpec(
            num_scalar_prefetch=0,
            grid=(G,),
            in_specs=[
                pl.BlockSpec((None, M, P), lambda g: (g, 0, 0)),  # student (packed)
                pl.BlockSpec((None, M, P), lambda g: (g, 0, 0)),  # teacher (packed)
                pl.BlockSpec((P, P), lambda g: (0, 0)),           # W1 block-diag
                pl.BlockSpec((P, P), lambda g: (0, 0)),           # W2 block-diag
                pl.BlockSpec((P, P), lambda g: (0, 0)),           # channel softmax mask
                pl.BlockSpec((P, P), lambda g: (0, 0)),           # head softmax mask
            ],
            out_specs=pl.BlockSpec((None, 1, 1), lambda g: (g, 0, 0)),
        ),
        compiler_params=pltpu.CompilerParams(
            dimension_semantics=("parallel",)),   # independent partials (v7x megacore)
    )(s_p, t_p, w1blk, w2blk, ch_mask, hd_mask)

    return jnp.sum(loss_parts) / (jnp.sum(mask_f) + 0.0001)


# -----------------------------------------------------------------------------
# Pure-JAX reference (mirrors the PyTorch module exactly, bias included)
# -----------------------------------------------------------------------------
def _ref_dot_prod_attn(x):
    score = jnp.einsum('bmc,bmd->bcd', x, x, precision='highest')
    score = score / jnp.sqrt(jnp.float32(x.shape[-2]))
    prob = jax.nn.softmax(score, axis=-2)
    return jnp.einsum('bmc,bcd->bmd', x, prob, precision='highest')


def _ref_det_heads_attention(x, w, b):
    channel = _ref_dot_prod_attn(x)
    parts, ptr = [], 0
    for h in HEADS:
        parts.append(_ref_dot_prod_attn(x[:, :, ptr:ptr + h]))
        ptr += h
    combined = jnp.concatenate([channel] + parts, axis=-1)            # (B, M, 22)
    return jnp.einsum('bmi,oi->bom', combined, w[:, :, 0],
                      precision='highest') + b[None, :, None]


def ref_attention_loss(out, target, mask, ind, conv_w, conv_b):
    s_out = _gather_peak_feats(out, ind)
    t_out = _gather_peak_feats(target, ind)
    mask_f = mask.astype(jnp.float32)[:, :, None]
    s_out = s_out * mask_f
    t_out = t_out * mask_f
    teacher = _ref_det_heads_attention(t_out, conv_w, conv_b)
    student = _ref_det_heads_attention(s_out, conv_w, conv_b)
    l1 = jnp.abs(student - teacher)
    return (l1 / (mask_f.sum() + 0.0001)).sum()


# -----------------------------------------------------------------------------
if __name__ == "__main__":
    key = jax.random.PRNGKey(0)
    k_out, k_tgt, k_ind, k_mask, k_w, k_b = jax.random.split(key, 6)

    # B=13 exercises a multi-step grid (ceil(13/11) = 2 lane-packed groups),
    # including a zero-padded tail group.
    B, H, W, M = 13, 16, 16, 16

    out = jax.random.normal(k_out, (B, C, H, W), dtype=jnp.float32)
    target = jax.random.normal(k_tgt, (B, C, H, W), dtype=jnp.float32)
    ind = jax.random.randint(k_ind, (B, M), 0, H * W, dtype=jnp.int32)
    mask = (jax.random.uniform(k_mask, (B, M)) > 0.3).astype(jnp.float32)

    # Deterministic Conv1d(22, 11, 1) parameters (PyTorch-style uniform bound).
    bound = 1.0 / math.sqrt(2 * C)
    conv_w = jax.random.uniform(k_w, (C, 2 * C, 1), minval=-bound, maxval=bound,
                                dtype=jnp.float32)
    conv_b = jax.random.uniform(k_b, (C,), minval=-bound, maxval=bound,
                                dtype=jnp.float32)

    loss = attention_loss(out, target, mask, ind, conv_w, conv_b)
    jax.block_until_ready(loss)

    ref = ref_attention_loss(out, target, mask, ind, conv_w, conv_b)
    # Tolerance covers the approximate EUP reciprocal used for the in-kernel
    # softmax normalization (relative error ~1e-3).
    np.testing.assert_allclose(np.asarray(loss), np.asarray(ref),
                               rtol=1e-2, atol=2e-3)

    print("KERNEL_OK")
</pallas_src>

<mosaic_0001>
module attributes {stable_mosaic.version = 11 : i64} {
  func.func @attention_loss_kernel(%arg0: i32, %arg1: memref<1x16x121xf32, #tpu.memory_space<vmem>>, %arg2: memref<1x16x121xf32, #tpu.memory_space<vmem>>, %arg3: memref<121x121xf32, #tpu.memory_space<vmem>>, %arg4: memref<121x121xf32, #tpu.memory_space<vmem>>, %arg5: memref<121x121xf32, #tpu.memory_space<vmem>>, %arg6: memref<121x121xf32, #tpu.memory_space<vmem>>, %arg7: memref<1x1x1xf32, #tpu.memory_space<vmem>>) attributes {dimension_semantics = [#tpu.dimension_semantics<parallel>], iteration_bounds = array<i64: 2>, scalar_prefetch = 0 : i64, scratch_operands = 0 : i64, tpu.core_type = #tpu.core_type<tc>, window_params = [{transform_indices = @transform_0, window_bounds = array<i64: 1, 16, 121>}, {transform_indices = @transform_1, window_bounds = array<i64: 1, 16, 121>}, {pipeline_mode = #tpu.pipeline_mode<synchronous>, transform_indices = @transform_2, window_bounds = array<i64: 121, 121>}, {pipeline_mode = #tpu.pipeline_mode<synchronous>, transform_indices = @transform_3, window_bounds = array<i64: 121, 121>}, {pipeline_mode = #tpu.pipeline_mode<synchronous>, transform_indices = @transform_4, window_bounds = array<i64: 121, 121>}, {pipeline_mode = #tpu.pipeline_mode<synchronous>, transform_indices = @transform_5, window_bounds = array<i64: 121, 121>}, {transform_indices = @transform_6, window_bounds = array<i64: 1, 1, 1>}]} {
    %c0 = arith.constant 0 : index
    %c0_0 = arith.constant 0 : index
    %0 = vector.load %arg3[%c0, %c0_0] : memref<121x121xf32, #tpu.memory_space<vmem>>, vector<121x121xf32>
    %c0_1 = arith.constant 0 : index
    %c0_2 = arith.constant 0 : index
    %1 = vector.load %arg4[%c0_1, %c0_2] : memref<121x121xf32, #tpu.memory_space<vmem>>, vector<121x121xf32>
    %c0_3 = arith.constant 0 : index
    %c0_4 = arith.constant 0 : index
    %2 = vector.load %arg5[%c0_3, %c0_4] : memref<121x121xf32, #tpu.memory_space<vmem>>, vector<121x121xf32>
    %c0_5 = arith.constant 0 : index
    %c0_6 = arith.constant 0 : index
    %3 = vector.load %arg6[%c0_5, %c0_6] : memref<121x121xf32, #tpu.memory_space<vmem>>, vector<121x121xf32>
    %c0_7 = arith.constant 0 : index
    %c0_8 = arith.constant 0 : index
    %c0_9 = arith.constant 0 : index
    %4 = vector.load %arg1[%c0_7, %c0_8, %c0_9] : memref<1x16x121xf32, #tpu.memory_space<vmem>>, vector<1x16x121xf32>
    %5 = vector.shape_cast %4 : vector<1x16x121xf32> to vector<16x121xf32>
    %cst = arith.constant dense<0.000000e+00> : vector<121x121xf32>
    %6 = tpu.matmul %5, %5, %cst {dimension_numbers = #tpu.dot_dimension_numbers<[0], [0], [1], [1], [0, 1, 1, 1], [], []>} : vector<16x121xf32>, vector<16x121xf32>, vector<121x121xf32> -> vector<121x121xf32>
    %cst_10 = arith.constant 2.500000e-01 : f32
    %7 = vector.broadcast %cst_10 : f32 to vector<121x121xf32>
    %8 = arith.mulf %6, %7 : vector<121x121xf32>
    %9 = arith.addf %8, %2 : vector<121x121xf32>
    %cst_11 = arith.constant dense<0xFF800000> : vector<121xf32>
    %10 = vector.multi_reduction <maximumf>, %9, %cst_11 [0] : vector<121x121xf32> to vector<121xf32>
    %11 = vector.shape_cast %10 : vector<121xf32> to vector<1x121xf32>
    %12 = vector.broadcast %11 : vector<1x121xf32> to vector<121x121xf32>
    %13 = arith.subf %9, %12 : vector<121x121xf32>
    %14 = math.exp %13 : vector<121x121xf32>
    %cst_12 = arith.constant dense<0.000000e+00> : vector<121xf32>
    %15 = vector.multi_reduction <add>, %14, %cst_12 [0] : vector<121x121xf32> to vector<121xf32>
    %16 = vector.shape_cast %15 : vector<121xf32> to vector<1x121xf32>
    %17 = tpu.reciprocal %16 {approx = true} : vector<1x121xf32> -> vector<1x121xf32>
    %18 = vector.broadcast %17 : vector<1x121xf32> to vector<121x121xf32>
    %19 = arith.mulf %14, %18 : vector<121x121xf32>
    %20 = arith.addf %8, %3 : vector<121x121xf32>
    %cst_13 = arith.constant dense<0xFF800000> : vector<121xf32>
    %21 = vector.multi_reduction <maximumf>, %20, %cst_13 [0] : vector<121x121xf32> to vector<121xf32>
    %22 = vector.shape_cast %21 : vector<121xf32> to vector<1x121xf32>
    %23 = vector.broadcast %22 : vector<1x121xf32> to vector<121x121xf32>
    %24 = arith.subf %20, %23 : vector<121x121xf32>
    %25 = math.exp %24 : vector<121x121xf32>
    %cst_14 = arith.constant dense<0.000000e+00> : vector<121xf32>
    %26 = vector.multi_reduction <add>, %25, %cst_14 [0] : vector<121x121xf32> to vector<121xf32>
    %27 = vector.shape_cast %26 : vector<121xf32> to vector<1x121xf32>
    %28 = tpu.reciprocal %27 {approx = true} : vector<1x121xf32> -> vector<1x121xf32>
    %29 = vector.broadcast %28 : vector<1x121xf32> to vector<121x121xf32>
    %30 = arith.mulf %25, %29 : vector<121x121xf32>
    %cst_15 = arith.constant dense<0.000000e+00> : vector<16x121xf32>
    %31 = tpu.matmul %5, %19, %cst_15 {dimension_numbers = #tpu.dot_dimension_numbers<[1], [0], [0], [1], [0, 0, 1, 1], [], []>} : vector<16x121xf32>, vector<121x121xf32>, vector<16x121xf32> -> vector<16x121xf32>
    %cst_16 = arith.constant dense<0.000000e+00> : vector<16x121xf32>
    %32 = tpu.matmul %5, %30, %cst_16 {dimension_numbers = #tpu.dot_dimension_numbers<[1], [0], [0], [1], [0, 0, 1, 1], [], []>} : vector<16x121xf32>, vector<121x121xf32>, vector<16x121xf32> -> vector<16x121xf32>
    %c0_17 = arith.constant 0 : index
    %c0_18 = arith.constant 0 : index
    %c0_19 = arith.constant 0 : index
    %33 = vector.load %arg2[%c0_17, %c0_18, %c0_19] : memref<1x16x121xf32, #tpu.memory_space<vmem>>, vector<1x16x121xf32>
    %34 = vector.shape_cast %33 : vector<1x16x121xf32> to vector<16x121xf32>
    %cst_20 = arith.constant dense<0.000000e+00> : vector<121x121xf32>
    %35 = tpu.matmul %34, %34, %cst_20 {dimension_numbers = #tpu.dot_dimension_numbers<[0], [0], [1], [1], [0, 1, 1, 1], [], []>} : vector<16x121xf32>, vector<16x121xf32>, vector<121x121xf32> -> vector<121x121xf32>
    %cst_21 = arith.constant 2.500000e-01 : f32
    %36 = vector.broadcast %cst_21 : f32 to vector<121x121xf32>
    %37 = arith.mulf %35, %36 : vector<121x121xf32>
    %38 = arith.addf %37, %2 : vector<121x121xf32>
    %cst_22 = arith.constant dense<0xFF800000> : vector<121xf32>
    %39 = vector.multi_reduction <maximumf>, %38, %cst_22 [0] : vector<121x121xf32> to vector<121xf32>
    %40 = vector.shape_cast %39 : vector<121xf32> to vector<1x121xf32>
    %41 = vector.broadcast %40 : vector<1x121xf32> to vector<121x121xf32>
    %42 = arith.subf %38, %41 : vector<121x121xf32>
    %43 = math.exp %42 : vector<121x121xf32>
    %cst_23 = arith.constant dense<0.000000e+00> : vector<121xf32>
    %44 = vector.multi_reduction <add>, %43, %cst_23 [0] : vector<121x121xf32> to vector<121xf32>
    %45 = vector.shape_cast %44 : vector<121xf32> to vector<1x121xf32>
    %46 = tpu.reciprocal %45 {approx = true} : vector<1x121xf32> -> vector<1x121xf32>
    %47 = vector.broadcast %46 : vector<1x121xf32> to vector<121x121xf32>
    %48 = arith.mulf %43, %47 : vector<121x121xf32>
    %49 = arith.addf %37, %3 : vector<121x121xf32>
    %cst_24 = arith.constant dense<0xFF800000> : vector<121xf32>
    %50 = vector.multi_reduction <maximumf>, %49, %cst_24 [0] : vector<121x121xf32> to vector<121xf32>
    %51 = vector.shape_cast %50 : vector<121xf32> to vector<1x121xf32>
    %52 = vector.broadcast %51 : vector<1x121xf32> to vector<121x121xf32>
    %53 = arith.subf %49, %52 : vector<121x121xf32>
    %54 = math.exp %53 : vector<121x121xf32>
    %cst_25 = arith.constant dense<0.000000e+00> : vector<121xf32>
    %55 = vector.multi_reduction <add>, %54, %cst_25 [0] : vector<121x121xf32> to vector<121xf32>
    %56 = vector.shape_cast %55 : vector<121xf32> to vector<1x121xf32>
    %57 = tpu.reciprocal %56 {approx = true} : vector<1x121xf32> -> vector<1x121xf32>
    %58 = vector.broadcast %57 : vector<1x121xf32> to vector<121x121xf32>
    %59 = arith.mulf %54, %58 : vector<121x121xf32>
    %cst_26 = arith.constant dense<0.000000e+00> : vector<16x121xf32>
    %60 = tpu.matmul %34, %48, %cst_26 {dimension_numbers = #tpu.dot_dimension_numbers<[1], [0], [0], [1], [0, 0, 1, 1], [], []>} : vector<16x121xf32>, vector<121x121xf32>, vector<16x121xf32> -> vector<16x121xf32>
    %cst_27 = arith.constant dense<0.000000e+00> : vector<16x121xf32>
    %61 = tpu.matmul %34, %59, %cst_27 {dimension_numbers = #tpu.dot_dimension_numbers<[1], [0], [0], [1], [0, 0, 1, 1], [], []>} : vector<16x121xf32>, vector<121x121xf32>, vector<16x121xf32> -> vector<16x121xf32>
    %62 = arith.subf %31, %60 : vector<16x121xf32>
    %cst_28 = arith.constant dense<0.000000e+00> : vector<16x121xf32>
    %63 = tpu.matmul %62, %0, %cst_28 {dimension_numbers = #tpu.dot_dimension_numbers<[1], [0], [0], [1], [0, 0, 1, 1], [], []>} : vector<16x121xf32>, vector<121x121xf32>, vector<16x121xf32> -> vector<16x121xf32>
    %64 = arith.subf %32, %61 : vector<16x121xf32>
    %cst_29 = arith.constant dense<0.000000e+00> : vector<16x121xf32>
    %65 = tpu.matmul %64, %1, %cst_29 {dimension_numbers = #tpu.dot_dimension_numbers<[1], [0], [0], [1], [0, 0, 1, 1], [], []>} : vector<16x121xf32>, vector<121x121xf32>, vector<16x121xf32> -> vector<16x121xf32>
    %66 = arith.addf %63, %65 : vector<16x121xf32>
    %67 = math.absf %66 : vector<16x121xf32>
    %68 = vector.shape_cast %67 : vector<16x121xf32> to vector<1x16x121xf32>
    %cst_30 = arith.constant dense<0.000000e+00> : vector<1xf32>
    %69 = vector.multi_reduction <add>, %68, %cst_30 [1, 2] : vector<1x16x121xf32> to vector<1xf32>
    %70 = vector.shape_cast %69 : vector<1xf32> to vector<1x1x1xf32>
    %71 = vector.extract %70[0, 0, 0] : f32 from vector<1x1x1xf32>
    %72 = vector.broadcast %71 : f32 to vector<1x1xf32>
    %c0_31 = arith.constant 0 : index
    %c0_32 = arith.constant 0 : index
    %c0_33 = arith.constant 0 : index
    %73 = vector.load %arg7[%c0_31, %c0_32, %c0_33] : memref<1x1x1xf32, #tpu.memory_space<vmem>>, vector<1x1x1xf32>
    %74 = vector.shape_cast %73 : vector<1x1x1xf32> to vector<1x1xf32>
    %75 = vector.shape_cast %72 : vector<1x1xf32> to vector<1x1x1xf32>
    tpu.vector_store %arg7[%c0_31, %c0_32, %c0_33], %75 {strides = array<i32>} : memref<1x1x1xf32, #tpu.memory_space<vmem>>, vector<1x1x1xf32>,
    return
  }
  func.func @transform_0(%arg0: i32) -> (i32, i32, i32) {
    %c0_i32 = arith.constant 0 : i32
    %c0_i32_0 = arith.constant 0 : i32
    %c0_i32_1 = arith.constant 0 : i32
    return %arg0, %c0_i32, %c0_i32_0 : i32, i32, i32
  }
  func.func @transform_1(%arg0: i32) -> (i32, i32, i32) {
    %c0_i32 = arith.constant 0 : i32
    %c0_i32_0 = arith.constant 0 : i32
    %c0_i32_1 = arith.constant 0 : i32
    return %arg0, %c0_i32, %c0_i32_0 : i32, i32, i32
  }
  func.func @transform_2(%arg0: i32) -> (i32, i32) {
    %c0_i32 = arith.constant 0 : i32
    %c0_i32_0 = arith.constant 0 : i32
    %c0_i32_1 = arith.constant 0 : i32
    return %c0_i32, %c0_i32_0 : i32, i32
  }
  func.func @transform_3(%arg0: i32) -> (i32, i32) {
    %c0_i32 = arith.constant 0 : i32
    %c0_i32_0 = arith.constant 0 : i32
    %c0_i32_1 = arith.constant 0 : i32
    return %c0_i32, %c0_i32_0 : i32, i32
  }
  func.func @transform_4(%arg0: i32) -> (i32, i32) {
    %c0_i32 = arith.constant 0 : i32
    %c0_i32_0 = arith.constant 0 : i32
    %c0_i32_1 = arith.constant 0 : i32
    return %c0_i32, %c0_i32_0 : i32, i32
  }
  func.func @transform_5(%arg0: i32) -> (i32, i32) {
    %c0_i32 = arith.constant 0 : i32
    %c0_i32_0 = arith.constant 0 : i32
    %c0_i32_1 = arith.constant 0 : i32
    return %c0_i32, %c0_i32_0 : i32, i32
  }
  func.func @transform_6(%arg0: i32) -> (i32, i32, i32) {
    %c0_i32 = arith.constant 0 : i32
    %c0_i32_0 = arith.constant 0 : i32
    %c0_i32_1 = arith.constant 0 : i32
    return %arg0, %c0_i32, %c0_i32_0 : i32, i32, i32
  }
}

</mosaic_0001>

<bundles_post_ra>
// kernel: attention_loss.1
= control target key start
LH: loop header
LB: loop body
LE: loop exit
PB: predicated region body
PF: predicated region fallthrough
CT: control target
= control target key end

     0   :  { %s2895_s21 = smov 0   ;;  %s4157_s0 = inlined_call_operand.vmem [shape: f32[2,16,121], index: 0, kind: input, shape index: {}]   ;;  %s4158_s1 = inlined_call_operand.vmem [shape: f32[2,16,121], index: 1, kind: input, shape index: {}]   ;;  %s4159_s2 = inlined_call_operand.vmem [shape: f32[121,121], index: 2, kind: input, shape index: {}]   ;;  %s4160_s3 = inlined_call_operand.vmem [shape: f32[121,121], index: 3, kind: input, shape index: {}]   ;;  %s4161_s4 = inlined_call_operand.vmem [shape: f32[121,121], index: 4, kind: input, shape index: {}]   ;;  %s4162_s5 = inlined_call_operand.vmem [shape: f32[121,121], index: 5, kind: input, shape index: {}]   ;;  %s4163_s6 = inlined_call_operand.vmem [shape: f32[2,1,1], index: 6, kind: output, shape index: {}]  }
   0x1 LB: > { %s2014_s22 = sadd.s32 4294967295, %s2857_s21   ;;  %p2018_p0 = scmp.ge.s32.totalorder %s2857_s21, 1  ;;  %s2857_s21 = sphi %s2895_s21, %s16_s21  }
   0x2   : > { %p222_p1 = scmp.lt.s32.totalorder %s2857_s21, 3 }
   0x4   : > { %p223_p2 = pnand %p2018_p0, %p222_p1 }
   0x6   : > { %226 = sbr.rel (%p223_p2) target bundleno = 1648 (0x670), region = 44 }
   0xd   : > { %p255_p3 = scmp.lt.s32.totalorder %s2014_s22, 1  ;;  %vm366_vm0 = vcmask 130048   ;;  %vm592_vm1 = vcmask 990208   ;;  %v2961_v26 = vld [vmem:[%s4161_s4 + $0x8] sm:$0xff]  ;;  %v2971_v29 = vld [vmem:[%s4161_s4] sm:$0xff]  ;;  %v3039_v52 = vld [vmem:[%s4161_s4 + $0x18] sm:$0xff] }
   0xe   : > { %v2966_v27 = vld [vmem:[%s4162_s5 + $0x8] sm:$0xff]  ;;  %4194 = vst [vmem:[#allocation2_spill] sm:$0xff] %v2971_v29  ;;  %v2976_v30 = vld [vmem:[%s4162_s5] sm:$0xff]  ;;  %4200 = vst [vmem:[#allocation8_spill] sm:$0xff] %v3039_v52  ;;  %vm619_vm2 = vcmask 983040   ;;  %vm894_vm3 = vcmask 1040384  }
   0xf   : > { %s4257_s22 = smov (!%p255_p3, %s2014_s22), 1  ;;  %4195 = vst [vmem:[#allocation3_spill] sm:$0xff] %v2976_v30  ;;  %v2990_v34 = vld [vmem:[%s4161_s4 + $0x28] sm:$0xff]  ;;  %v3003_v39 = vld [vmem:[%s4161_s4 + $0x20] sm:$0xff]  ;;  %v3044_v53 = vld [vmem:[%s4162_s5 + $0x18] sm:$0xff]  ;;  %vm2859_vm4 = vmmov 1  }
  0x10   : > { %s2075_s23 = sshll.u32 %s4257_s22, 4  ;;  %4196 = vst [vmem:[#allocation4_spill] sm:$0xff] %v2990_v34  ;;  %v2995_v35 = vld [vmem:[%s4162_s5 + $0x28] sm:$0xff]  ;;  %4198 = vst [vmem:[#allocation6_spill] sm:$0xff] %v3003_v39  ;;  %v3008_v40 = vld [vmem:[%s4162_s5 + $0x20] sm:$0xff]  ;;  %vm1953_vm6 = vcmask 0  }
  0x11   : > { %s2911_s26 = scalar_lea.vmem %s4157_s0, %s2075_s23  ;;  %s2946_s29 = scalar_lea.vmem %s4158_s1, %s2075_s23  ;;  %4197 = vst [vmem:[#allocation5_spill] sm:$0xff] %v2995_v35  ;;  %4199 = vst [vmem:[#allocation7_spill] sm:$0xff] %v3008_v40  ;;  %v3053_v57 = vld [vmem:[%s4161_s4 + $0x10] sm:$0xff] }
  0x12   : > { %v2914_v0 = vld [vmem:[%s2911_s26] sm:$0xff]  ;;  %v2917_v1 = vld [vmem:[%s2911_s26 + $0x8] sm:$0xff]  ;;  %4201 = vst [vmem:[#allocation9_spill] sm:$0xff] %v3044_v53  ;;  %4202 = vst [vmem:[#allocation10_spill] sm:$0xff] %v3053_v57 }
  0x13   : > { %334 = vxpose.xlu0.b32.start [1/2] (short) %v2914_v0, 128  ;;  %v2487_v2 = vpack.c.bf16 %v2917_v1, %v2914_v0  ;;  %2281 = vmatprep.mubr.msk.f32.mxu1 %vm592_vm1, %v2914_v0  ;;  %v2949_v19 = vld [vmem:[%s2946_s29] sm:$0xff]  ;;  %v2955_v20 = vld [vmem:[%s2946_s29 + $0x8] sm:$0xff]  ;;  %v3058_v58 = vld [vmem:[%s4162_s5 + $0x10] sm:$0xff] }
  0x14   : > { %1053 = vxpose.xlu1.b32.start [1/2] (short) %v2949_v19, 128  ;;  %4203 = vst [vmem:[#allocation11_spill] sm:$0xff] %v3058_v58  ;;  %vm3555_vm5 = vmpackc.low %vm894_vm3, %vm2859_vm4 }
  0x15   : > { %2488 = vmatprep.subr.bf16.mxu0 %v2487_v2 }
  0x16   : > { %2490 = vmatpush3.bf16.msra.mxu0 %v2487_v2 }
  0x17   : > { %335 = vxpose.xlu0.b32.end [2/2] (short) %v2917_v1, 128 }
  0x18   : > { %1054 = vxpose.xlu1.b32.end [2/2] (short) %v2955_v20, 128 }
  0x93   : > { %v350_v3 = vpop.trf.xlu0 }
  0x94   : > { %2225 = vmatprep.mubr.msk.f32.mxu0 %vm366_vm0, %v350_v3 }
  0x97   : > { %v351_v4 = vpop.trf.xlu0 }
  0x98   : > { %2226 = vmatmul.mubr.msk.f32.vlgmr.msra.gmra.mrb[0].mxu0 %vm366_vm0, %v351_v4 }
  0x9b   : > { %v352_v5 = vpop.trf.xlu0 }
  0x9c   : > { %2228 = vmatprep.mubr.msk.f32.mxu0 %vm366_vm0, %v352_v5  ;;  %v3076_v5 = vld [vmem:[%s4161_s4 + $0x38] sm:$0xff] }
  0x9d   : > { %4204 = vst [vmem:[#allocation12_spill] sm:$0xff] %v3076_v5 }
  0x9f   : > { %v353_v6 = vpop.trf.xlu0 }
  0xa0   : > { %2229 = vmatmul.mubr.msk.f32.gmra.mrb[2].mxu0 %vm366_vm0, %v353_v6  ;;  %v3081_v6 = vld [vmem:[%s4162_s5 + $0x38] sm:$0xff] }
  0xa1   : > { %4205 = vst [vmem:[#allocation13_spill] sm:$0xff] %v3081_v6 }
  0xa3   : > { %v354_v7 = vpop.trf.xlu0 }
  0xa4   : > { %2231 = vmatprep.mubr.msk.f32.mxu0 %vm366_vm0, %v354_v7 }
  0xa7   : > { %v355_v8 = vpop.trf.xlu0 }
  0xa8   : > { %2232 = vmatmul.mubr.msk.f32.gmra.mrb[4].mxu0 %vm366_vm0, %v355_v8 }
  0xab   : > { %v356_v9 = vpop.trf.xlu0 }
  0xac   : > { %2234 = vmatprep.mubr.msk.f32.mxu0 %vm366_vm0, %v356_v9 }
  0xaf   : > { %v357_v10 = vpop.trf.xlu0 }
  0xb0   : > { %2235 = vmatmul.mubr.msk.f32.gmra.mrb[6].mxu0 %vm366_vm0, %v357_v10 }
  0xb3   : > { %v358_v11 = vpop.trf.xlu0 }
  0xb4   : > { %2237 = vmatprep.mubr.msk.f32.mxu0 %vm366_vm0, %v358_v11  ;;  %v3092_v11 = vld [vmem:[%s4161_s4 + $0x30] sm:$0xff] }
  0xb5   : > { %4206 = vst [vmem:[#allocation14_spill] sm:$0xff] %v3092_v11 }
  0xb7   : > { %v359_v12 = vpop.trf.xlu0 }
  0xb8   : > { %2238 = vmatmul.mubr.msk.f32.gmra.mrb[8].mxu0 %vm366_vm0, %v359_v12  ;;  %v3097_v12 = vld [vmem:[%s4162_s5 + $0x30] sm:$0xff] }
  0xb9   : > { %4207 = vst [vmem:[#allocation15_spill] sm:$0xff] %v3097_v12 }
  0xbb   : > { %v360_v13 = vpop.trf.xlu0 }
  0xbc   : > { %2240 = vmatprep.mubr.msk.f32.mxu0 %vm366_vm0, %v360_v13 }
  0xbf   : > { %v361_v14 = vpop.trf.xlu0 }
  0xc0   : > { %2241 = vmatmul.mubr.msk.f32.gmra.mrb[10].mxu0 %vm366_vm0, %v361_v14 }
  0xc3   : > { %v362_v15 = vpop.trf.xlu0 }
  0xc4   : > { %2243 = vmatprep.mubr.msk.f32.mxu0 %vm366_vm0, %v362_v15 }
  0xc7   : > { %v363_v16 = vpop.trf.xlu0 }
  0xc8   : > { %2244 = vmatmul.mubr.msk.f32.gmra.mrb[12].mxu0 %vm366_vm0, %v363_v16 }
  0xcb   : > { %v364_v17 = vpop.trf.xlu0 }
  0xcc   : > { %2246 = vmatprep.mubr.msk.f32.mxu0 %vm366_vm0, %v364_v17 }
  0xcf   : > { %v365_v18 = vpop.trf.xlu0 }
  0xd0   : > { %2247 = vmatmul.mubr.msk.f32.gmra.mrb[14].mxu0 %vm366_vm0, %v365_v18 }
  0xd1   : > { %2379 = vmatprep.mubr.msk.f32.mxu0 %vm592_vm1, %v2949_v19 }
 0x16b   : > { %v2227_v21 = vpop.f32.mrb[0].mxu0 }
 0x16c   : > { %v481_v22 = vpop.f32.mrb[1].mxu0  ;;  %v561_v25 = vmul.f32 0.25, %v2227_v21 }
 0x16d   : > { %v560_v28 = vmul.f32 0.25, %v481_v22 }
 0x16e   : > { %v2979_v31 = vadd.f32 %v561_v25, %v2961_v26  ;;  %v2982_v32 = vadd.f32 %v561_v25, %v2966_v27 }
 0x16f   : > { %v2985_v33 = vadd.f32 %v560_v28, %v2971_v29  ;;  %v2998_v37 = vadd.f32 %v560_v28, %v2976_v30 }
 0x170   : > { %v3012_v43 = vsel %vm592_vm1, %v2979_v31, -inf  ;;  %v3016_v44 = vsel %vm592_vm1, %v2982_v32, -inf }
 0x171   : > { %v3026_v47 = vsel %vm592_vm1, %v2985_v33, -inf  ;;  %v749_v51 = vsel %vm592_vm1, %v2998_v37, -inf }
 0x173   : > { %v2230_v23 = vpop.f32.mrb[2].mxu0 }
 0x174   : > { %v491_v24 = vpop.f32.mrb[3].mxu0  ;;  %v563_v48 = vmul.f32 0.25, %v2230_v23 }
 0x175   : > { %v562_v54 = vmul.f32 0.25, %v491_v24 }
 0x176   : > { %v3068_v3 = vadd.f32 %v563_v48, %v3039_v52  ;;  %v3071_v4 = vadd.f32 %v563_v48, %v3044_v53  ;;  %v3135_v48 = vld [vmem:[%s4162_s5 + $0x48] sm:$0xff] }
 0x177   : > { %v3084_v8 = vadd.f32 %v562_v54, %v3053_v57  ;;  %v3087_v9 = vadd.f32 %v562_v54, %v3058_v58  ;;  %4209 = vst [vmem:[#allocation17_spill] sm:$0xff] %v3135_v48  ;;  %v3260_v58 = vld [vmem:[%s4161_s4 + $0x70] sm:$0xff] }
 0x178   : > { %v596_v17 = vsel %vm592_vm1, %v3068_v3, -inf  ;;  %v752_v18 = vsel %vm592_vm1, %v3071_v4, -inf  ;;  %4222 = vst [vmem:[#allocation30_spill] sm:$0xff] %v3260_v58 }
 0x179   : > { %v595_v23 = vsel %vm592_vm1, %v3084_v8, -inf  ;;  %v751_v24 = vsel %vm592_vm1, %v3087_v9, -inf }
 0x17b   : > { %v2233_v36 = vpop.f32.mrb[4].mxu0 }
 0x17c   : > { %v565_v38 = vmul.f32 0.25, %v2233_v36  ;;  %v501_v41 = vpop.f32.mrb[5].mxu0 }
 0x17d   : > { %v564_v42 = vmul.f32 0.25, %v501_v41 }
 0x17e   : > { %v3019_v45 = vadd.f32 %v565_v38, %v2990_v34  ;;  %v3022_v46 = vadd.f32 %v565_v38, %v2995_v35 }
 0x17f   : > { %v3029_v49 = vadd.f32 %v564_v42, %v3003_v39  ;;  %v3032_v50 = vadd.f32 %v564_v42, %v3008_v40 }
 0x180   : > { %v599_v55 = vsel %vm592_vm1, %v3019_v45, -inf  ;;  %v755_v56 = vsel %vm592_vm1, %v3022_v46, -inf }
 0x181   : > { %v600_v59 = vmax.f32 %v3012_v43, %v599_v55  ;;  %v756_v60 = vmax.f32 %v3016_v44, %v755_v56  ;;  %v597_v61 = vsel %vm592_vm1, %v3029_v49, -inf  ;;  %v753_v62 = vsel %vm592_vm1, %v3032_v50, -inf  ;;  %v3140_v55 = vld [vmem:[%s4161_s4 + $0x40] sm:$0xff] }
 0x182   : > { %v598_v63 = vmax.f32 %v3026_v47, %v597_v61  ;;  %v754_v2 = vmax.f32 %v749_v51, %v753_v62  ;;  %v3130_v47 = vld [vmem:[%s4161_s4 + $0x48] sm:$0xff]  ;;  %4210 = vst [vmem:[#allocation18_spill] sm:$0xff] %v3140_v55  ;;  %v3145_v56 = vld [vmem:[%s4162_s5 + $0x40] sm:$0xff] }
 0x183   : > { %v2236_v7 = vpop.f32.mrb[6].mxu0  ;;  %4208 = vst [vmem:[#allocation16_spill] sm:$0xff] %v3130_v47  ;;  %4211 = vst [vmem:[#allocation19_spill] sm:$0xff] %v3145_v56 }
 0x184   : > { %v567_v10 = vmul.f32 0.25, %v2236_v7  ;;  %v511_v13 = vpop.f32.mrb[7].mxu0 }
 0x185   : > { %v566_v14 = vmul.f32 0.25, %v511_v13 }
 0x186   : > { %v3100_v15 = vadd.f32 %v567_v10, %v3076_v5  ;;  %v3103_v16 = vadd.f32 %v567_v10, %v3081_v6 }
 0x187   : > { %v3110_v21 = vadd.f32 %v566_v14, %v3092_v11  ;;  %v3113_v22 = vadd.f32 %v566_v14, %v3097_v12 }
 0x188   : > { %v603_v25 = vsel %vm592_vm1, %v3100_v15, -inf  ;;  %v759_v28 = vsel %vm592_vm1, %v3103_v16, -inf }
 0x189   : > { %v604_v36 = vmax.f32 %v596_v17, %v603_v25  ;;  %v760_v38 = vmax.f32 %v752_v18, %v759_v28  ;;  %v601_v41 = vsel %vm592_vm1, %v3110_v21, -inf  ;;  %v757_v42 = vsel %vm592_vm1, %v3113_v22, -inf }
 0x18a   : > { %v602_v43 = vmax.f32 %v595_v23, %v601_v41  ;;  %v758_v44 = vmax.f32 %v751_v24, %v757_v42 }
 0x18b   : > { %v2239_v51 = vpop.f32.mrb[8].mxu0 }
 0x18c   : > { %v569_v54 = vmul.f32 0.25, %v2239_v51  ;;  %v521_v61 = vpop.f32.mrb[9].mxu0  ;;  %v3170_v51 = vld [vmem:[%s4161_s4 + $0x58] sm:$0xff] }
 0x18d   : > { %v568_v62 = vmul.f32 0.25, %v521_v61  ;;  %4212 = vst [vmem:[#allocation20_spill] sm:$0xff] %v3170_v51  ;;  %v3180_v61 = vld [vmem:[%s4161_s4 + $0x50] sm:$0xff] }
 0x18e   : > { %v3148_v7 = vadd.f32 %v569_v54, %v3130_v47  ;;  %v3151_v10 = vadd.f32 %v569_v54, %v3135_v48  ;;  %v3175_v54 = vld [vmem:[%s4162_s5 + $0x58] sm:$0xff]  ;;  %4214 = vst [vmem:[#allocation22_spill] sm:$0xff] %v3180_v61 }
 0x18f   : > { %v3154_v13 = vadd.f32 %v568_v62, %v3140_v55  ;;  %v3157_v14 = vadd.f32 %v568_v62, %v3145_v56  ;;  %4213 = vst [vmem:[#allocation21_spill] sm:$0xff] %v3175_v54 }
 0x190   : > { %v607_v17 = vsel %vm592_vm1, %v3148_v7, -inf  ;;  %v763_v18 = vsel %vm592_vm1, %v3151_v10, -inf }
 0x191   : > { %v608_v23 = vmax.f32 %v600_v59, %v607_v17  ;;  %v764_v24 = vmax.f32 %v756_v60, %v763_v18  ;;  %v605_v25 = vsel %vm592_vm1, %v3154_v13, -inf  ;;  %v761_v28 = vsel %vm592_vm1, %v3157_v14, -inf }
 0x192   : > { %v606_v41 = vmax.f32 %v598_v63, %v605_v25  ;;  %v762_v42 = vmax.f32 %v754_v2, %v761_v28  ;;  %v3185_v63 = vld [vmem:[%s4162_s5 + $0x50] sm:$0xff] }
 0x193   : > { %v2242_v59 = vpop.f32.mrb[10].mxu0  ;;  %4215 = vst [vmem:[#allocation23_spill] sm:$0xff] %v3185_v63 }
 0x194   : > { %v571_v60 = vmul.f32 0.25, %v2242_v59  ;;  %v531_v2 = vpop.f32.mrb[11].mxu0 }
 0x195   : > { %v570_v62 = vmul.f32 0.25, %v531_v2 }
 0x196   : > { %v3188_v17 = vadd.f32 %v571_v60, %v3170_v51  ;;  %v3191_v18 = vadd.f32 %v571_v60, %v3175_v54 }
 0x197   : > { %v3194_v25 = vadd.f32 %v570_v62, %v3180_v61  ;;  %v3197_v28 = vadd.f32 %v570_v62, %v3185_v63  ;;  %v3210_v62 = vld [vmem:[%s4161_s4 + $0x68] sm:$0xff] }
 0x198   : > { %v611_v59 = vsel %vm592_vm1, %v3188_v17, -inf  ;;  %v767_v56 = vsel %vm592_vm1, %v3191_v18, -inf  ;;  %4216 = vst [vmem:[#allocation24_spill] sm:$0xff] %v3210_v62  ;;  %v3215_v63 = vld [vmem:[%s4162_s5 + $0x68] sm:$0xff] }
 0x199   : > { %v612_v55 = vmax.f32 %v604_v36, %v611_v59  ;;  %v768_v2 = vmax.f32 %v760_v38, %v767_v56  ;;  %v609_v51 = vsel %vm592_vm1, %v3194_v25, -inf  ;;  %v765_v60 = vsel %vm592_vm1, %v3197_v28, -inf  ;;  %4217 = vst [vmem:[#allocation25_spill] sm:$0xff] %v3215_v63  ;;  %v3220_v56 = vld [vmem:[%s4161_s4 + $0x60] sm:$0xff] }
 0x19a   : > { %v610_v54 = vmax.f32 %v602_v43, %v609_v51  ;;  %v766_v61 = vmax.f32 %v758_v44, %v765_v60  ;;  %4218 = vst [vmem:[#allocation26_spill] sm:$0xff] %v3220_v56  ;;  %v3225_v43 = vld [vmem:[%s4162_s5 + $0x60] sm:$0xff] }
 0x19b   : > { %v2245_v36 = vpop.f32.mrb[12].mxu0  ;;  %4219 = vst [vmem:[#allocation27_spill] sm:$0xff] %v3225_v43 }
 0x19c   : > { %v573_v38 = vmul.f32 0.25, %v2245_v36  ;;  %v541_v44 = vpop.f32.mrb[13].mxu0 }
 0x19d   : > { %v572_v51 = vmul.f32 0.25, %v541_v44 }
 0x19e   : > { %v3228_v59 = vadd.f32 %v573_v38, %v3210_v62  ;;  %v3231_v60 = vadd.f32 %v573_v38, %v3215_v63 }
 0x19f   : > { %v3234_v36 = vadd.f32 %v572_v51, %v3220_v56  ;;  %v3237_v48 = vadd.f32 %v572_v51, %v3225_v43  ;;  %v3250_v51 = vld [vmem:[%s4161_s4 + $0x78] sm:$0x1] }
 0x1a0   : > { %v615_v47 = vsel %vm592_vm1, %v3228_v59, -inf  ;;  %v771_v12 = vsel %vm592_vm1, %v3231_v60, -inf  ;;  %4220 = vst [vmem:[#allocation28_spill] sm:$0xff] %v3250_v51  ;;  %v3255_v43 = vld [vmem:[%s4162_s5 + $0x78] sm:$0x1] }
 0x1a1   : > { %v616_v11 = vmax.f32 %v608_v23, %v615_v47  ;;  %v772_v44 = vmax.f32 %v764_v24, %v771_v12  ;;  %v613_v62 = vsel %vm592_vm1, %v3234_v36, -inf  ;;  %v769_v38 = vsel %vm592_vm1, %v3237_v48, -inf  ;;  %4221 = vst [vmem:[#allocation29_spill] sm:$0xff] %v3255_v43 }
 0x1a2   : > { %v614_v63 = vmax.f32 %v606_v41, %v613_v62  ;;  %v770_v56 = vmax.f32 %v762_v42, %v769_v38  ;;  %v3265_v41 = vld [vmem:[%s4162_s5 + $0x70] sm:$0xff] }
 0x1a3   : > { %v2248_v47 = vpop.f32.mrb[14].mxu0  ;;  %4223 = vst [vmem:[#allocation31_spill] sm:$0xff] %v3265_v41 }
 0x1a4   : > { %v622_v12 = vmax.f32 %v614_v63, %v616_v11  ;;  %v777_v23 = vmax.f32 %v770_v56, %v772_v44  ;;  %v575_v24 = vmul.f32 0.25, %v2248_v47  ;;  %v551_v42 = vpop.f32.mrb[15].mxu0 }
 0x1a5   : > { %v574_v62 = vmul.f32 0.25, %v551_v42 }
 0x1a6   : > { %v3268_v38 = vadd.f32 %v575_v24, %v3250_v51  ;;  %v3271_v11 = vadd.f32 %v575_v24, %v3255_v43 }
 0x1a7   : > { %v3274_v63 = vadd.f32 %v574_v62, %v3260_v58  ;;  %v3277_v56 = vadd.f32 %v574_v62, %v3265_v41 }
 0x1a8   : > { %v620_v44 = vsel %vm619_vm2, %v3268_v38, -inf  ;;  %v775_v47 = vsel %vm619_vm2, %v3271_v11, -inf }
 0x1a9   : > { %v621_v57 = vmax.f32 %v612_v55, %v620_v44  ;;  %v776_v42 = vmax.f32 %v768_v2, %v775_v47  ;;  %v617_v51 = vsel %vm592_vm1, %v3274_v63, -inf  ;;  %v773_v24 = vsel %vm592_vm1, %v3277_v56, -inf }
 0x1aa   : > { %v618_v43 = vmax.f32 %v610_v54, %v617_v51  ;;  %v774_v58 = vmax.f32 %v766_v61, %v773_v24 }
 0x1ac   : > { %v623_v6 = vmax.f32 %v618_v43, %v621_v57  ;;  %v778_v5 = vmax.f32 %v774_v58, %v776_v42 }
 0x1ae   : > { %v624_v62 = vmax.f32 %v622_v12, %v623_v6  ;;  %v779_v41 = vmax.f32 %v777_v23, %v778_v5 }
 0x1b0   : > { %v625_v53 = vrot.slane %v624_v62, 4  ;;  %v780_v40 = vrot.slane %v779_v41, 4 }
 0x1b2   : > { %v626_v39 = vmax.f32 %v624_v62, %v625_v53  ;;  %v781_v52 = vmax.f32 %v779_v41, %v780_v40 }
 0x1b4   : > { %v627_v35 = vrot.slane %v626_v39, 2  ;;  %v782_v34 = vrot.slane %v781_v52, 2 }
 0x1b6   : > { %v628_v55 = vmax.f32 %v626_v39, %v627_v35  ;;  %v783_v2 = vmax.f32 %v781_v52, %v782_v34 }
 0x1b8   : > { %v629_v44 = vrot.slane %v628_v55, 1  ;;  %v784_v47 = vrot.slane %v783_v2, 1 }
 0x1ba   : > { %v3287_v30 = vmax.f32 %v628_v55, %v629_v44  ;;  %v3289_v29 = vmax.f32 %v783_v2, %v784_v47 }
 0x1bc   : > { %v645_v57 = vsub.f32 %v3274_v63, %v3287_v30  ;;  %v800_v58 = vsub.f32 %v3277_v56, %v3289_v29  ;;  %v631_v53 = vsub.f32 %v2985_v33, %v3287_v30  ;;  %v632_v40 = vsub.f32 %v2979_v31, %v3287_v30 }
 0x1bd   : > { %v633_v34 = vsub.f32 %v3084_v8, %v3287_v30  ;;  %v634_v35 = vsub.f32 %v3068_v3, %v3287_v30  ;;  %v635_v39 = vsub.f32 %v3029_v49, %v3287_v30  ;;  %v636_v52 = vsub.f32 %v3019_v45, %v3287_v30 }
 0x1be   : > { %v637_v5 = vsub.f32 %v3110_v21, %v3287_v30  ;;  %v638_v33 = vsub.f32 %v3100_v15, %v3287_v30  ;;  %v639_v31 = vsub.f32 %v3154_v13, %v3287_v30  ;;  %v640_v6 = vsub.f32 %v3148_v7, %v3287_v30 }
 0x1bf   : > { %v641_v3 = vsub.f32 %v3194_v25, %v3287_v30  ;;  %v642_v49 = vsub.f32 %v3188_v17, %v3287_v30  ;;  %v643_v45 = vsub.f32 %v3234_v36, %v3287_v30  ;;  %v644_v8 = vsub.f32 %v3228_v59, %v3287_v30 }
 0x1c0   : > { %v646_v15 = vsub.f32 %v3268_v38, %v3287_v30  ;;  %v647_v21 = vmul.f32 1.442695, %v631_v53  ;;  %v649_v13 = vmul.f32 1.442695, %v632_v40  ;;  %v651_v54 = vmul.f32 1.442695, %v633_v34 }
 0x1c1   : > { %v653_v61 = vmul.f32 1.442695, %v634_v35  ;;  %v786_v7 = vsub.f32 %v2998_v37, %v3289_v29  ;;  %v655_v25 = vmul.f32 1.442695, %v635_v39  ;;  %v657_v17 = vmul.f32 1.442695, %v636_v52 }
 0x1c2   : > { %2713 = vpow2.f32 %v647_v21  ;;  %v787_v43 = vsub.f32 %v2982_v32, %v3289_v29  ;;  %v788_v36 = vsub.f32 %v3087_v9, %v3289_v29  ;;  %v789_v51 = vsub.f32 %v3071_v4, %v3289_v29 }
 0x1c3   : > { %2715 = vpow2.f32 %v649_v13  ;;  %v659_v12 = vmul.f32 1.442695, %v637_v5  ;;  %v790_v23 = vsub.f32 %v3032_v50, %v3289_v29  ;;  %v791_v37 = vsub.f32 %v3022_v46, %v3289_v29 }
 0x1c4   : > { %2717 = vpow2.f32 %v651_v54  ;;  %v792_v41 = vsub.f32 %v3113_v22, %v3289_v29  ;;  %v793_v32 = vsub.f32 %v3103_v16, %v3289_v29  ;;  %v794_v9 = vsub.f32 %v3157_v14, %v3289_v29 }
 0x1c5   : > { %2719 = vpow2.f32 %v653_v61  ;;  %v795_v4 = vsub.f32 %v3151_v10, %v3289_v29  ;;  %v796_v42 = vsub.f32 %v3197_v28, %v3289_v29  ;;  %v797_v50 = vsub.f32 %v3191_v18, %v3289_v29 }
 0x1c6   : > { %2721 = vpow2.f32 %v655_v25  ;;  %v798_v46 = vsub.f32 %v3237_v48, %v3289_v29  ;;  %v661_v22 = vmul.f32 1.442695, %v638_v33  ;;  %v799_v16 = vsub.f32 %v3231_v60, %v3289_v29 }
 0x1c7   : > { %2723 = vpow2.f32 %v657_v17  ;;  %v801_v24 = vsub.f32 %v3271_v11, %v3289_v29  ;;  %v663_v62 = vmul.f32 1.442695, %v639_v31  ;;  %v665_v55 = vmul.f32 1.442695, %v640_v6 }
 0x1c8   : > { %2725 = vpow2.f32 %v659_v12  ;;  %v667_v44 = vmul.f32 1.442695, %v641_v3  ;;  %v802_v40 = vmul.f32 1.442695, %v786_v7  ;;  %v804_v39 = vmul.f32 1.442695, %v787_v43 }
 0x1c9   : > { %2727 = vpow2.f32 %v661_v22  ;;  %v806_v33 = vmul.f32 1.442695, %v788_v36  ;;  %v808_v6 = vmul.f32 1.442695, %v789_v51  ;;  %v669_v21 = vmul.f32 1.442695, %v642_v49 }
 0x1ca   : > { %2729 = vpow2.f32 %v663_v62  ;;  %v810_v61 = vmul.f32 1.442695, %v790_v23  ;;  %v671_v25 = vmul.f32 1.442695, %v643_v45  ;;  %v812_v36 = vmul.f32 1.442695, %v791_v37 }
 0x1cb   : > { %2731 = vpow2.f32 %v665_v55  ;;  %v673_v49 = vmul.f32 1.442695, %v644_v8  ;;  %v814_v45 = vmul.f32 1.442695, %v792_v41  ;;  %v675_v62 = vmul.f32 1.442695, %v645_v57 }
 0x1cc   : > { %v3355_v2 = vpop.eup %2713  ;;  %2733 = vpow2.f32 %v667_v44  ;;  %v816_v8 = vmul.f32 1.442695, %v793_v32  ;;  %v677_v41 = vmul.f32 1.442695, %v646_v15  ;;  %v818_v57 = vmul.f32 1.442695, %v794_v9 }
 0x1cd   : > { %v3357_v47 = vpop.eup %2715  ;;  %v679_v53 = vsel %vm592_vm1, %v3355_v2, 0.0  ;;  %2735 = vpow2.f32 %v802_v40  ;;  %v820_v38 = vmul.f32 1.442695, %v795_v4  ;;  %v822_v10 = vmul.f32 1.442695, %v796_v42 }
 0x1ce   : > { %v3361_v34 = vpop.eup %2717  ;;  %v680_v35 = vsel %vm592_vm1, %v3357_v47, 0.0  ;;  %2737 = vpow2.f32 %v804_v39  ;;  %v832_v56 = vmul.f32 1.442695, %v801_v24 }
 0x1cf   : > { %v3365_v52 = vpop.eup %2719  ;;  %v681_v5 = vadd.f32 %v680_v35, %v679_v53  ;;  %v682_v31 = vsel %vm592_vm1, %v3361_v34, 0.0  ;;  %2739 = vpow2.f32 %v806_v33 }
 0x1d0   : > { %v3369_v3 = vpop.eup %2721  ;;  %v684_v54 = vsel %vm592_vm1, %v3365_v52, 0.0  ;;  %2741 = vpow2.f32 %v808_v6 }
 0x1d1   : > { %v683_v13 = vadd.f32 %v682_v31, %v681_v5  ;;  %v3373_v7 = vpop.eup %2723  ;;  %v686_v43 = vsel %vm592_vm1, %v3369_v3, 0.0  ;;  %2743 = vpow2.f32 %v669_v21 }
 0x1d2   : > { %v3377_v51 = vpop.eup %2725  ;;  %v688_v23 = vsel %vm592_vm1, %v3373_v7, 0.0  ;;  %2745 = vpow2.f32 %v810_v61 }
 0x1d3   : > { %v685_v17 = vadd.f32 %v684_v54, %v683_v13  ;;  %v3384_v22 = vpop.eup %2727  ;;  %2747 = vpow2.f32 %v671_v25  ;;  %v690_v59 = vsel %vm592_vm1, %v3377_v51, 0.0  ;;  %v824_v25 = vmul.f32 1.442695, %v797_v50 }
 0x1d4   : > { %v3389_v55 = vpop.eup %2729  ;;  %2749 = vpow2.f32 %v812_v36  ;;  %v692_v63 = vsel %vm592_vm1, %v3384_v22, 0.0 }
 0x1d5   : > { %v687_v12 = vadd.f32 %v686_v43, %v685_v17  ;;  %v3393_v44 = vpop.eup %2731  ;;  %2751 = vpow2.f32 %v673_v49  ;;  %v694_v30 = vsel %vm592_vm1, %v3389_v55, 0.0 }
 0x1d6   : > { %v3398_v40 = vpop.eup %2733  ;;  %2753 = vpow2.f32 %v814_v45  ;;  %v696_v31 = vsel %vm592_vm1, %v3393_v44, 0.0 }
 0x1d7   : > { %v689_v37 = vadd.f32 %v688_v23, %v687_v12  ;;  %v3405_v35 = vpop.eup %2735  ;;  %2755 = vpow2.f32 %v675_v62  ;;  %v698_v61 = vsel %vm592_vm1, %v3398_v40, 0.0  ;;  %v826_v12 = vmul.f32 1.442695, %v798_v46 }
 0x1d8   : > { %v3407_v39 = vpop.eup %2737  ;;  %2757 = vpow2.f32 %v816_v8  ;;  %v834_v15 = vsel %vm592_vm1, %v3405_v35, 0.0 }
 0x1d9   : > { %v691_v53 = vadd.f32 %v690_v59, %v689_v37  ;;  %v3416_v5 = vpop.eup %2739  ;;  %2759 = vpow2.f32 %v677_v41  ;;  %v835_v9 = vsel %vm592_vm1, %v3407_v39, 0.0  ;;  %v828_v59 = vmul.f32 1.442695, %v799_v16 }
 0x1da   : > { %v3420_v33 = vpop.eup %2741  ;;  %2761 = vpow2.f32 %v818_v57  ;;  %v836_v4 = vadd.f32 %v835_v9, %v834_v15  ;;  %v837_v13 = vsel %vm592_vm1, %v3416_v5, 0.0 }
 0x1db   : > { %v693_v32 = vadd.f32 %v692_v63, %v691_v53  ;;  %v3427_v6 = vpop.eup %2743  ;;  %2763 = vpow2.f32 %v820_v38  ;;  %v839_v43 = vsel %vm592_vm1, %v3420_v33, 0.0  ;;  %v830_v63 = vmul.f32 1.442695, %v800_v58 }
 0x1dc   : > { %v3431_v54 = vpop.eup %2745  ;;  %v838_v17 = vadd.f32 %v837_v13, %v836_v4  ;;  %v700_v49 = vsel %vm592_vm1, %v3427_v6, 0.0  ;;  %2765 = vpow2.f32 %v822_v10 }
 0x1dd   : > { %v695_v14 = vadd.f32 %v694_v30, %v693_v32  ;;  %v3438_v28 = vpop.eup %2747  ;;  %v841_v45 = vsel %vm592_vm1, %v3431_v54, 0.0  ;;  %2767 = vpow2.f32 %v824_v25 }
 0x1de   : > { %v3442_v36 = vpop.eup %2749  ;;  %v840_v23 = vadd.f32 %v839_v43, %v838_v17  ;;  %v702_v37 = vsel %vm592_vm1, %v3438_v28, 0.0  ;;  %2769 = vpow2.f32 %v826_v12 }
 0x1df   : > { %v697_v21 = vadd.f32 %v696_v31, %v695_v14  ;;  %v3449_v18 = vpop.eup %2751  ;;  %v843_v41 = vsel %vm592_vm1, %v3442_v36, 0.0  ;;  %2771 = vpow2.f32 %v828_v59 }
 0x1e0   : > { %v3453_v62 = vpop.eup %2753  ;;  %v842_v8 = vadd.f32 %v841_v45, %v840_v23  ;;  %v704_v57 = vsel %vm592_vm1, %v3449_v18, 0.0  ;;  %2773 = vpow2.f32 %v830_v63 }
 0x1e1   : > { %v699_v42 = vadd.f32 %v698_v61, %v697_v21  ;;  %v3460_v48 = vpop.eup %2755  ;;  %v845_v30 = vsel %vm592_vm1, %v3453_v62, 0.0  ;;  %2775 = vpow2.f32 %v832_v56 }
 0x1e2   : > { %v3464_v53 = vpop.eup %2757  ;;  %v844_v32 = vadd.f32 %v843_v41, %v842_v8  ;;  %v706_v15 = vsel %vm592_vm1, %v3460_v48, 0.0 }
 0x1e3   : > { %v701_v50 = vadd.f32 %v700_v49, %v699_v42  ;;  %v3471_v60 = vpop.eup %2759  ;;  %v847_v9 = vsel %vm592_vm1, %v3464_v53, 0.0 }
 0x1e4   : > { %v3475_v38 = vpop.eup %2761  ;;  %v846_v58 = vadd.f32 %v845_v30, %v844_v32  ;;  %v708_v10 = vsel %vm619_vm2, %v3471_v60, 0.0 }
 0x1e5   : > { %v703_v46 = vadd.f32 %v702_v37, %v701_v50  ;;  %v3484_v31 = vpop.eup %2763  ;;  %v849_v13 = vsel %vm592_vm1, %v3475_v38, 0.0 }
 0x1e6   : > { %v848_v4 = vadd.f32 %v847_v9, %v846_v58  ;;  %v3490_v61 = vpop.eup %2765  ;;  %v851_v24 = vsel %vm592_vm1, %v3484_v31, 0.0 }
 0x1e7   : > { %v705_v16 = vadd.f32 %v704_v57, %v703_v46  ;;  %v3494_v25 = vpop.eup %2767  ;;  %v853_v43 = vsel %vm592_vm1, %v3490_v61, 0.0 }
 0x1e8   : > { %v850_v29 = vadd.f32 %v849_v13, %v848_v4  ;;  %v3498_v49 = vpop.eup %2769  ;;  %v855_v50 = vsel %vm592_vm1, %v3494_v25, 0.0 }
 0x1e9   : > { %v707_v14 = vadd.f32 %v706_v15, %v705_v16  ;;  %v3502_v45 = vpop.eup %2771  ;;  %v857_v8 = vsel %vm592_vm1, %v3498_v49, 0.0 }
 0x1ea   : > { %v852_v17 = vadd.f32 %v851_v24, %v850_v29  ;;  %v3506_v46 = vpop.eup %2773  ;;  %v859_v57 = vsel %vm592_vm1, %v3502_v45, 0.0 }
 0x1eb   : > { %v709_v21 = vadd.f32 %v708_v10, %v707_v14  ;;  %v3510_v32 = vpop.eup %2775  ;;  %v861_v30 = vsel %vm592_vm1, %v3506_v46, 0.0 }
 0x1ec   : > { %v854_v12 = vadd.f32 %v853_v43, %v852_v17  ;;  %v863_v58 = vsel %vm619_vm2, %v3510_v32, 0.0 }
 0x1ed   : > { %v710_v11 = vrot.slane %v709_v21, 4 }
 0x1ee   : > { %v856_v37 = vadd.f32 %v855_v50, %v854_v12 }
 0x1ef   : > { %v711_v42 = vadd.f32 %v710_v11, %v709_v21 }
 0x1f0   : > { %v858_v41 = vadd.f32 %v857_v8, %v856_v37 }
 0x1f1   : > { %v712_v23 = vrot.slane %v711_v42, 2 }
 0x1f2   : > { %v860_v16 = vadd.f32 %v859_v57, %v858_v41 }
 0x1f3   : > { %v713_v59 = vadd.f32 %v712_v23, %v711_v42 }
 0x1f4   : > { %v862_v56 = vadd.f32 %v861_v30, %v860_v16 }
 0x1f5   : > { %v714_v63 = vrot.slane %v713_v59, 1 }
 0x1f6   : > { %v864_v14 = vadd.f32 %v863_v58, %v862_v56 }
 0x1f7   : > { %v715_v15 = vadd.f32 %v714_v63, %v713_v59 }
 0x1f8   : > { %v865_v9 = vrot.slane %v864_v14, 4 }
 0x1f9   : > { %2777 = vrcp.f32 %v715_v15 }
 0x1fa   : > { %v866_v10 = vadd.f32 %v865_v9, %v864_v14 }
 0x1fc   : > { %v867_v4 = vrot.slane %v866_v10, 2 }
 0x1fe   : > { %v868_v13 = vadd.f32 %v867_v4, %v866_v10 }
 0x200   : > { %v869_v63 = vrot.slane %v868_v13, 1 }
 0x202   : > { %v870_v16 = vadd.f32 %v869_v63, %v868_v13  ;;  %v4227_v63 = vld [vmem:[#allocation3_spill] sm:$0xff] }
 0x203   : > { %v2778_v21 = vpop.eup %2777 }
 0x204   : > { %v717_v29 = vmul.f32 %v2778_v21, %v3355_v2  ;;  %v718_v11 = vmul.f32 %v2778_v21, %v3357_v47  ;;  %v719_v24 = vmul.f32 %v2778_v21, %v3361_v34  ;;  %v720_v17 = vmul.f32 %v2778_v21, %v3365_v52 }
 0x205   : > { %v721_v42 = vmul.f32 %v2778_v21, %v3369_v3  ;;  %v722_v43 = vmul.f32 %v2778_v21, %v3373_v7  ;;  %v723_v12 = vmul.f32 %v2778_v21, %v3377_v51  ;;  %v724_v23 = vmul.f32 %v2778_v21, %v3384_v22 }
 0x206   : > { %v2491_v50 = vpack.c.bf16 %v718_v11, %v717_v29  ;;  %v2495_v37 = vpack.c.bf16 %v720_v17, %v719_v24  ;;  %v725_v59 = vmul.f32 %v2778_v21, %v3389_v55  ;;  %v726_v2 = vmul.f32 %v2778_v21, %v3393_v44 }
 0x207   : > { %v2499_v8 = vpack.c.bf16 %v722_v43, %v721_v42  ;;  %v2503_v47 = vpack.c.bf16 %v724_v23, %v723_v12  ;;  %v727_v34 = vmul.f32 %v2778_v21, %v3398_v40  ;;  %v728_v52 = vmul.f32 %v2778_v21, %v3427_v6  ;;  %v3532_v40 = vpop.trf.xlu1  ;;  %v2849_v42 = vld [vmem:[%s2911_s26 + $0x8] sm:$0xff]  ;;  %s267_s26 = scalar_lea.vmem %s4163_s6, %s4257_s22 }
 0x208   : > { %2492 = vmatprep.subr.bf16.mxu1 %v2491_v50  ;;  %v2507_v3 = vpack.c.bf16 %v726_v2, %v725_v59  ;;  %v729_v7 = vmul.f32 %v2778_v21, %v3438_v28  ;;  %v730_v51 = vmul.f32 %v2778_v21, %v3449_v18  ;;  %v731_v22 = vmul.f32 %v2778_v21, %v3460_v48 }
 0x209   : > { %2494 = vmatpush3.bf16.msra.mxu1 %v2491_v50  ;;  %v2511_v41 = vpack.c.bf16 %v728_v52, %v727_v34  ;;  %v732_v55 = vmul.f32 %v2778_v21, %v3471_v60  ;;  %2779 = vrcp.f32 %v870_v16 }
 0x20a   : > { %2496 = vmatprep.subr.bf16.mxu1 %v2495_v37  ;;  %v2515_v44 = vpack.c.bf16 %v730_v51, %v729_v7 }
 0x20b   : > { %v2519_v57 = vpack.c.bf16 %v732_v55, %v731_v22  ;;  %v3534_v6 = vpop.trf.xlu1 }
 0x20d   : > { %2498 = vmatpush3.bf16.msra.mxu1 %v2495_v37 }
 0x20e   : > { %2500 = vmatprep.subr.bf16.mxu1 %v2499_v8 }
 0x20f   : > { %v3536_v18 = vpop.trf.xlu1 }
 0x211   : > { %2502 = vmatpush3.bf16.msra.mxu1 %v2499_v8 }
 0x212   : > { %2504 = vmatprep.subr.bf16.mxu1 %v2503_v47 }
 0x213   : > { %v2780_v28 = vpop.eup %2779  ;;  %v1072_v29 = vpop.trf.xlu1 }
 0x214   : > { %v872_v48 = vmul.f32 %v2780_v28, %v3405_v35  ;;  %v873_v60 = vmul.f32 %v2780_v28, %v3407_v39  ;;  %v874_v30 = vmul.f32 %v2780_v28, %v3416_v5  ;;  %v875_v15 = vmul.f32 %v2780_v28, %v3420_v33 }
 0x215   : > { %2506 = vmatpush3.bf16.msra.mxu1 %v2503_v47  ;;  %v876_v56 = vmul.f32 %v2780_v28, %v3431_v54  ;;  %v877_v58 = vmul.f32 %v2780_v28, %v3442_v36  ;;  %v878_v14 = vmul.f32 %v2780_v28, %v3453_v62  ;;  %v879_v9 = vmul.f32 %v2780_v28, %v3464_v53 }
 0x216   : > { %2508 = vmatprep.subr.bf16.mxu1 %v2507_v3  ;;  %v2525_v10 = vpack.c.bf16 %v873_v60, %v872_v48  ;;  %v2529_v4 = vpack.c.bf16 %v875_v15, %v874_v30  ;;  %v880_v35 = vmul.f32 %v2780_v28, %v3475_v38  ;;  %v881_v39 = vmul.f32 %v2780_v28, %v3484_v31  ;;  %v4228_v60 = vld [vmem:[#allocation4_spill] sm:$0xff]  ;;  %v4229_v15 = vld [vmem:[#allocation5_spill] sm:$0xff] }
 0x217   : > { %v2533_v21 = vpack.c.bf16 %v877_v58, %v876_v56  ;;  %v2537_v5 = vpack.c.bf16 %v879_v9, %v878_v14  ;;  %v882_v33 = vmul.f32 %v2780_v28, %v3490_v61  ;;  %v883_v13 = vmul.f32 %v2780_v28, %v3494_v25  ;;  %v4230_v58 = vld [vmem:[#allocation8_spill] sm:$0xff] }
 0x218   : > { %v2541_v54 = vpack.c.bf16 %v881_v39, %v880_v35  ;;  %v884_v36 = vmul.f32 %v2780_v28, %v3498_v49  ;;  %v885_v62 = vmul.f32 %v2780_v28, %v3502_v45  ;;  %v886_v53 = vmul.f32 %v2780_v28, %v3506_v46  ;;  %v1073_v49 = vpop.trf.xlu1  ;;  %v4232_v35 = vld [vmem:[#allocation7_spill] sm:$0xff] }
 0x219   : > { %2510 = vmatpush3.bf16.msra.mxu1 %v2507_v3  ;;  %v2545_v11 = vpack.c.bf16 %v883_v13, %v882_v33  ;;  %v887_v38 = vmul.f32 %v2780_v28, %v3510_v32 }
 0x21a   : > { %2512 = vmatprep.subr.bf16.mxu1 %v2511_v41  ;;  %v2549_v31 = vpack.c.bf16 %v885_v62, %v884_v36 }
 0x21b   : > { %v2553_v25 = vpack.c.bf16 %v887_v38, %v886_v53 }
 0x21c   : > { %v1074_v45 = vpop.trf.xlu1 }
 0x21d   : > { %2514 = vmatpush3.bf16.msra.mxu1 %v2511_v41 }
 0x21e   : > { %2516 = vmatprep.subr.bf16.mxu1 %v2515_v44 }
 0x220   : > { %v1075_v46 = vpop.trf.xlu1 }
 0x221   : > { %2518 = vmatpush3.bf16.msra.mxu1 %v2515_v44 }
 0x222   : > { %2521 = vmatprep.subr.msk.bf16.mxu1 %vm3555_vm5, %v2519_v57 }
 0x224   : > { %v1076_v32 = vpop.trf.xlu1 }
 0x225   : > { %2524 = vmatpush3.bf16.msk.msra.mxu1 %vm3555_vm5, %v2519_v57 }
 0x226   : > { %2526 = vmatprep.subr.bf16.mxu1 %v2525_v10 }
 0x228   : > { %2282 = vmatmul.mubr.msk.f32.vlgmr.msra.gmra.mrb[0].mxu1 %vm592_vm1, %v2917_v1  ;;  %v1077_v24 = vpop.trf.xlu1 }
 0x229   : > { %2528 = vmatpush3.bf16.msra.mxu1 %v2525_v10  ;;  %2316 = vmatprep.mubr.msk.f32.mxu1 %vm592_vm1, %v2914_v0  ;;  %v2559_v0 = vpack.c.bf16 %v2955_v20, %v2949_v19  ;;  %v4231_v10 = vld [vmem:[#allocation6_spill] sm:$0xff] }
 0x22a   : > { %2530 = vmatprep.subr.bf16.mxu1 %v2529_v4 }
 0x22c   : > { %v1078_v1 = vpop.trf.xlu1 }
 0x22d   : > { %2532 = vmatpush3.bf16.msra.mxu1 %v2529_v4 }
 0x22e   : > { %2534 = vmatprep.subr.bf16.mxu1 %v2533_v21 }
 0x230   : > { %v1079_v17 = vpop.trf.xlu1 }
 0x231   : > { %2536 = vmatpush3.bf16.msra.mxu1 %v2533_v21 }
 0x232   : > { %2538 = vmatprep.subr.bf16.mxu1 %v2537_v5 }
 0x234   : > { %v1080_v43 = vpop.trf.xlu1 }
 0x235   : > { %2540 = vmatpush3.bf16.msra.mxu1 %v2537_v5  ;;  %v4233_v5 = vld [vmem:[#allocation9_spill] sm:$0xff] }
 0x236   : > { %2542 = vmatprep.subr.bf16.mxu1 %v2541_v54 }
 0x238   : > { %v1081_v20 = vpop.trf.xlu1 }
 0x239   : > { %2544 = vmatpush3.bf16.msra.mxu1 %v2541_v54 }
 0x23a   : > { %2546 = vmatprep.subr.bf16.mxu1 %v2545_v11 }
 0x23c   : > { %v1082_v12 = vpop.trf.xlu1 }
 0x23d   : > { %2548 = vmatpush3.bf16.msra.mxu1 %v2545_v11 }
 0x23e   : > { %2550 = vmatprep.subr.bf16.mxu1 %v2549_v31 }
 0x240   : > { %v1083_v23 = vpop.trf.xlu1 }
 0x241   : > { %2552 = vmatpush3.bf16.msra.mxu1 %v2549_v31 }
 0x242   : > { %2555 = vmatprep.subr.msk.bf16.mxu1 %vm3555_vm5, %v2553_v25 }
 0x244   : > { %v1084_v50 = vpop.trf.xlu1 }
 0x245   : > { %2558 = vmatpush3.bf16.msk.msra.mxu1 %vm3555_vm5, %v2553_v25 }
 0x246   : > { %2560 = vmatprep.subr.bf16.mxu1 %v2559_v0 }
 0x248   : > { %2317 = vmatmul.mubr.msk.f32.vlgmr.msra.gmra.mrb[2].mxu1 %vm592_vm1, %v2849_v42 }
 0x249   : > { %2562 = vmatpush3.bf16.msra.mxu1 %v2559_v0  ;;  %2323 = vmatprep.mubr.msk.f32.mxu1 %vm366_vm0, %v3532_v40 }
 0x24c   : > { %2324 = vmatmul.mubr.msk.f32.vlgmr.msra.gmra.mrb[4].mxu1 %vm366_vm0, %v3534_v6 }
 0x24d   : > { %2326 = vmatprep.mubr.msk.f32.mxu1 %vm366_vm0, %v3536_v18 }
 0x250   : > { %2327 = vmatmul.mubr.msk.f32.gmra.mrb[6].mxu1 %vm366_vm0, %v1072_v29 }
 0x251   : > { %2329 = vmatprep.mubr.msk.f32.mxu1 %vm366_vm0, %v1073_v49  ;;  %v4234_v49 = vld [vmem:[#allocation12_spill] sm:$0xff] }
 0x254   : > { %2330 = vmatmul.mubr.msk.f32.gmra.mrb[8].mxu1 %vm366_vm0, %v1074_v45 }
 0x255   : > { %2332 = vmatprep.mubr.msk.f32.mxu1 %vm366_vm0, %v1075_v46  ;;  %v4235_v46 = vld [vmem:[#allocation13_spill] sm:$0xff] }
 0x258   : > { %2333 = vmatmul.mubr.msk.f32.gmra.mrb[10].mxu1 %vm366_vm0, %v1076_v32 }
 0x259   : > { %2335 = vmatprep.mubr.msk.f32.mxu1 %vm366_vm0, %v1077_v24 }
 0x25c   : > { %2336 = vmatmul.mubr.msk.f32.gmra.mrb[12].mxu1 %vm366_vm0, %v1078_v1  ;;  %v4236_v1 = vld [vmem:[#allocation10_spill] sm:$0xff] }
 0x25d   : > { %2338 = vmatprep.mubr.msk.f32.mxu1 %vm366_vm0, %v1079_v17  ;;  %v4237_v17 = vld [vmem:[#allocation11_spill] sm:$0xff] }
 0x260   : > { %2339 = vmatmul.mubr.msk.f32.gmra.mrb[14].mxu1 %vm366_vm0, %v1080_v43 }
 0x261   : > { %2341 = vmatprep.mubr.msk.f32.mxu1 %vm366_vm0, %v1081_v20 }
 0x264   : > { %2342 = vmatmul.mubr.msk.f32.gmra.mrb[16].mxu1 %vm366_vm0, %v1082_v12 }
 0x265   : > { %2344 = vmatprep.mubr.msk.f32.mxu1 %vm366_vm0, %v1083_v23 }
 0x268   : > { %2345 = vmatmul.mubr.msk.f32.gmra.mrb[18].mxu1 %vm366_vm0, %v1084_v50 }
 0x269   : > { %2414 = vmatprep.mubr.msk.f32.mxu1 %vm592_vm1, %v2949_v19  ;;  %v4226_v19 = vld [vmem:[#allocation2_spill] sm:$0xff] }
 0x2fb   : > { %v3596_v37 = vpop.f32.mrb[0].mxu1 }
 0x2fc   : > { %v3598_v59 = vpop.f32.mrb[1].mxu1 }
 0x31b   : > { %v3600_v2 = vpop.f32.mrb[2].mxu1 }
 0x31c   : > { %v3602_v8 = vpop.f32.mrb[3].mxu1 }
 0x31f   : > { %v2325_v47 = vpop.f32.mrb[4].mxu1 }
 0x320   : > { %v1199_v34 = vpop.f32.mrb[5].mxu1  ;;  %v1279_v52 = vmul.f32 0.25, %v2325_v47 }
 0x321   : > { %v1278_v3 = vmul.f32 0.25, %v1199_v34 }
 0x322   : > { %v3605_v22 = vadd.f32 %v1279_v52, %v2961_v26  ;;  %v3608_v41 = vadd.f32 %v1279_v52, %v2966_v27 }
 0x323   : > { %v2328_v7 = vpop.f32.mrb[6].mxu1  ;;  %v3611_v55 = vadd.f32 %v1278_v3, %v4226_v19  ;;  %v3614_v44 = vadd.f32 %v1278_v3, %v4227_v63  ;;  %v4239_v19 = vld [vmem:[#allocation15_spill] sm:$0xff] }
 0x324   : > { %v1209_v51 = vpop.f32.mrb[7].mxu1  ;;  %v1281_v57 = vmul.f32 0.25, %v2328_v7  ;;  %v1311_v28 = vsel %vm592_vm1, %v3605_v22, -inf  ;;  %v1466_v26 = vsel %vm592_vm1, %v3608_v41, -inf  ;;  %v4238_v7 = vld [vmem:[#allocation14_spill] sm:$0xff] }
 0x325   : > { %v1310_v27 = vsel %vm592_vm1, %v3611_v55, -inf  ;;  %v1465_v48 = vsel %vm592_vm1, %v3614_v44, -inf  ;;  %v1280_v9 = vmul.f32 0.25, %v1209_v51 }
 0x326   : > { %v3631_v14 = vadd.f32 %v1281_v57, %v4230_v58  ;;  %v3640_v33 = vadd.f32 %v1281_v57, %v4233_v5  ;;  %v4240_v57 = vld [vmem:[#allocation16_spill] sm:$0xff] }
 0x327   : > { %v2331_v16 = vpop.f32.mrb[8].mxu1  ;;  %v3659_v0 = vadd.f32 %v1280_v9, %v4236_v1  ;;  %v3662_v42 = vadd.f32 %v1280_v9, %v4237_v17 }
 0x328   : > { %v1283_v40 = vmul.f32 0.25, %v2331_v16  ;;  %v1219_v6 = vpop.f32.mrb[9].mxu1  ;;  %v1313_v24 = vsel %vm592_vm1, %v3631_v14, -inf  ;;  %v1468_v12 = vsel %vm592_vm1, %v3640_v33, -inf }
 0x329   : > { %v1282_v18 = vmul.f32 0.25, %v1219_v6 }
 0x32a   : > { %v3625_v30 = vadd.f32 %v1283_v40, %v4228_v60  ;;  %v3628_v56 = vadd.f32 %v1283_v40, %v4229_v15  ;;  %v4241_v40 = vld [vmem:[#allocation17_spill] sm:$0xff] }
 0x32b   : > { %v3634_v4 = vadd.f32 %v1282_v18, %v4231_v10  ;;  %v3637_v39 = vadd.f32 %v1282_v18, %v4232_v35  ;;  %v2334_v21 = vpop.f32.mrb[10].mxu1  ;;  %v1467_v18 = vsel %vm592_vm1, %v3662_v42, -inf }
 0x32c   : > { %v1316_v13 = vsel %vm592_vm1, %v3625_v30, -inf  ;;  %v1471_v54 = vsel %vm592_vm1, %v3628_v56, -inf  ;;  %v1285_v36 = vmul.f32 0.25, %v2334_v21  ;;  %v1229_v62 = vpop.f32.mrb[11].mxu1 }
 0x32d   : > { %v1317_v53 = vmax.f32 %v1311_v28, %v1316_v13  ;;  %v1472_v29 = vmax.f32 %v1466_v26, %v1471_v54  ;;  %v1314_v11 = vsel %vm592_vm1, %v3634_v4, -inf  ;;  %v1469_v38 = vsel %vm592_vm1, %v3637_v39, -inf  ;;  %v4242_v13 = vld [vmem:[#allocation18_spill] sm:$0xff] }
 0x32e   : > { %v1315_v31 = vmax.f32 %v1310_v27, %v1314_v11  ;;  %v1470_v25 = vmax.f32 %v1465_v48, %v1469_v38  ;;  %v3651_v45 = vadd.f32 %v1285_v36, %v4234_v49  ;;  %v3654_v32 = vadd.f32 %v1285_v36, %v4235_v46  ;;  %v4243_v36 = vld [vmem:[#allocation19_spill] sm:$0xff] }
 0x32f   : > { %v1284_v43 = vmul.f32 0.25, %v1229_v62  ;;  %v2337_v20 = vpop.f32.mrb[12].mxu1  ;;  %v1312_v26 = vsel %vm592_vm1, %v3659_v0, -inf }
 0x330   : > { %v1320_v23 = vsel %vm592_vm1, %v3651_v45, -inf  ;;  %v1475_v50 = vsel %vm592_vm1, %v3654_v32, -inf  ;;  %v1287_v47 = vmul.f32 0.25, %v2337_v20  ;;  %v1239_v34 = vpop.f32.mrb[13].mxu1 }
 0x331   : > { %v1321_v52 = vmax.f32 %v1313_v24, %v1320_v23  ;;  %v1476_v3 = vmax.f32 %v1468_v12, %v1475_v50  ;;  %v3671_v51 = vadd.f32 %v1284_v43, %v4238_v7  ;;  %v3674_v63 = vadd.f32 %v1284_v43, %v4239_v19  ;;  %v4244_v43 = vld [vmem:[#allocation20_spill] sm:$0xff]  ;;  %v4246_v23 = vld [vmem:[#allocation22_spill] sm:$0xff] }
 0x332   : > { %v3677_v16 = vadd.f32 %v1287_v47, %v4240_v57  ;;  %v3680_v6 = vadd.f32 %v1287_v47, %v4241_v40  ;;  %v1286_v28 = vmul.f32 0.25, %v1239_v34  ;;  %v4247_v47 = vld [vmem:[#allocation23_spill] sm:$0xff] }
 0x333   : > { %v1318_v27 = vsel %vm592_vm1, %v3671_v51, -inf  ;;  %v1473_v48 = vsel %vm592_vm1, %v3674_v63, -inf  ;;  %v2340_v60 = vpop.f32.mrb[14].mxu1 }
 0x334   : > { %v1319_v15 = vmax.f32 %v1312_v26, %v1318_v27  ;;  %v1474_v58 = vmax.f32 %v1467_v18, %v1473_v48  ;;  %v1324_v9 = vsel %vm592_vm1, %v3677_v16, -inf  ;;  %v1479_v10 = vsel %vm592_vm1, %v3680_v6, -inf  ;;  %v1249_v35 = vpop.f32.mrb[15].mxu1 }
 0x335   : > { %v1325_v21 = vmax.f32 %v1317_v53, %v1324_v9  ;;  %v1480_v5 = vmax.f32 %v1472_v29, %v1479_v10  ;;  %v3695_v54 = vadd.f32 %v1286_v28, %v4242_v13  ;;  %v3698_v62 = vadd.f32 %v1286_v28, %v4243_v36  ;;  %v4245_v29 = vld [vmem:[#allocation21_spill] sm:$0xff]  ;;  %v4250_v36 = vld [vmem:[#allocation26_spill] sm:$0xff] }
 0x336   : > { %v1289_v11 = vmul.f32 0.25, %v2340_v60  ;;  %v1288_v38 = vmul.f32 0.25, %v1249_v35  ;;  %v4248_v60 = vld [vmem:[#allocation24_spill] sm:$0xff]  ;;  %v4249_v10 = vld [vmem:[#allocation25_spill] sm:$0xff] }
 0x337   : > { %v1322_v49 = vsel %vm592_vm1, %v3695_v54, -inf  ;;  %v1477_v46 = vsel %vm592_vm1, %v3698_v62, -inf  ;;  %v2343_v24 = vpop.f32.mrb[16].mxu1 }
 0x338   : > { %v1323_v1 = vmax.f32 %v1315_v31, %v1322_v49  ;;  %v1478_v17 = vmax.f32 %v1470_v25, %v1477_v46  ;;  %v3705_v53 = vadd.f32 %v1289_v11, %v4244_v43  ;;  %v3708_v20 = vadd.f32 %v1289_v11, %v4245_v29  ;;  %v1259_v12 = vpop.f32.mrb[17].mxu1 }
 0x339   : > { %v3711_v50 = vadd.f32 %v1288_v38, %v4246_v23  ;;  %v3714_v34 = vadd.f32 %v1288_v38, %v4247_v47  ;;  %v1291_v7 = vmul.f32 0.25, %v2343_v24  ;;  %v1290_v19 = vmul.f32 0.25, %v1259_v12  ;;  %v4252_v47 = vld [vmem:[#allocation28_spill] sm:$0xff] }
 0x33a   : > { %v1328_v57 = vsel %vm592_vm1, %v3705_v53, -inf  ;;  %v1483_v31 = vsel %vm592_vm1, %v3708_v20, -inf }
 0x33b   : > { %v1329_v25 = vmax.f32 %v1321_v52, %v1328_v57  ;;  %v1484_v40 = vmax.f32 %v1476_v3, %v1483_v31  ;;  %v1326_v28 = vsel %vm592_vm1, %v3711_v50, -inf  ;;  %v1481_v26 = vsel %vm592_vm1, %v3714_v34, -inf  ;;  %v2346_v18 = vpop.f32.mrb[18].mxu1  ;;  %v4251_v52 = vld [vmem:[#allocation27_spill] sm:$0xff]  ;;  %v4254_v31 = vld [vmem:[#allocation30_spill] sm:$0xff] }
 0x33c   : > { %v1327_v27 = vmax.f32 %v1319_v15, %v1326_v28  ;;  %v1482_v48 = vmax.f32 %v1474_v58, %v1481_v26  ;;  %v3725_v9 = vadd.f32 %v1291_v7, %v4248_v60  ;;  %v3728_v35 = vadd.f32 %v1291_v7, %v4249_v10  ;;  %v1269_v13 = vpop.f32.mrb[19].mxu1  ;;  %v4255_v26 = vld [vmem:[#allocation31_spill] sm:$0xff] }
 0x33d   : > { %v3731_v11 = vadd.f32 %v1290_v19, %v4250_v36  ;;  %v3734_v3 = vadd.f32 %v1290_v19, %v4251_v52  ;;  %v1293_v38 = vmul.f32 0.25, %v2346_v18  ;;  %v1292_v49 = vmul.f32 0.25, %v1269_v13  ;;  %v4253_v19 = vld [vmem:[#allocation29_spill] sm:$0xff] }
 0x33e   : > { %v1332_v46 = vsel %vm592_vm1, %v3725_v9, -inf  ;;  %v1487_v15 = vsel %vm592_vm1, %v3728_v35, -inf }
 0x33f   : > { %v1333_v58 = vmax.f32 %v1325_v21, %v1332_v46  ;;  %v1488_v24 = vmax.f32 %v1480_v5, %v1487_v15  ;;  %v1330_v43 = vsel %vm592_vm1, %v3731_v11, -inf  ;;  %v1485_v29 = vsel %vm592_vm1, %v3734_v3, -inf }
 0x340   : > { %v1331_v12 = vmax.f32 %v1323_v1, %v1330_v43  ;;  %v1486_v23 = vmax.f32 %v1478_v17, %v1485_v29  ;;  %v3745_v7 = vadd.f32 %v1293_v38, %v4252_v47  ;;  %v3748_v57 = vadd.f32 %v1293_v38, %v4253_v19 }
 0x341   : > { %v3751_v28 = vadd.f32 %v1292_v49, %v4254_v31  ;;  %v3754_v21 = vadd.f32 %v1292_v49, %v4255_v26 }
 0x342   : > { %v1338_v5 = vmax.f32 %v1331_v12, %v1333_v58  ;;  %v1493_v18 = vmax.f32 %v1486_v23, %v1488_v24  ;;  %v1336_v60 = vsel %vm619_vm2, %v3745_v7, -inf  ;;  %v1491_v1 = vsel %vm619_vm2, %v3748_v57, -inf }
 0x343   : > { %v1337_v17 = vmax.f32 %v1329_v25, %v1336_v60  ;;  %v1492_v10 = vmax.f32 %v1484_v40, %v1491_v1  ;;  %v1334_v13 = vsel %vm592_vm1, %v3751_v28, -inf  ;;  %v1489_v36 = vsel %vm592_vm1, %v3754_v21, -inf }
 0x344   : > { %v1335_v52 = vmax.f32 %v1327_v27, %v1334_v13  ;;  %v1490_v38 = vmax.f32 %v1482_v48, %v1489_v36 }
 0x346   : > { %v1339_v49 = vmax.f32 %v1335_v52, %v1337_v17  ;;  %v1494_v46 = vmax.f32 %v1490_v38, %v1492_v10 }
 0x348   : > { %v1340_v15 = vmax.f32 %v1338_v5, %v1339_v49  ;;  %v1495_v58 = vmax.f32 %v1493_v18, %v1494_v46 }
 0x34a   : > { %v1341_v24 = vrot.slane %v1340_v15, 4  ;;  %v1496_v43 = vrot.slane %v1495_v58, 4 }
 0x34c   : > { %v1342_v29 = vmax.f32 %v1340_v15, %v1341_v24  ;;  %v1497_v12 = vmax.f32 %v1495_v58, %v1496_v43 }
 0x34e   : > { %v1343_v23 = vrot.slane %v1342_v29, 2  ;;  %v1498_v47 = vrot.slane %v1497_v12, 2 }
 0x350   : > { %v1344_v25 = vmax.f32 %v1342_v29, %v1343_v23  ;;  %v1499_v40 = vmax.f32 %v1497_v12, %v1498_v47 }
 0x352   : > { %v1345_v19 = vrot.slane %v1344_v25, 1  ;;  %v1500_v31 = vrot.slane %v1499_v40, 1 }
 0x354   : > { %v3764_v26 = vmax.f32 %v1344_v25, %v1345_v19  ;;  %v3766_v60 = vmax.f32 %v1499_v40, %v1500_v31 }
 0x356   : > { %v1361_v27 = vsub.f32 %v3751_v28, %v3764_v26  ;;  %v1516_v48 = vsub.f32 %v3754_v21, %v3766_v60  ;;  %v1347_v5 = vsub.f32 %v3611_v55, %v3764_v26  ;;  %v1348_v18 = vsub.f32 %v3605_v22, %v3764_v26 }
 0x357   : > { %v1349_v1 = vsub.f32 %v3659_v0, %v3764_v26  ;;  %v1350_v17 = vsub.f32 %v3631_v14, %v3764_v26  ;;  %v1351_v10 = vsub.f32 %v3634_v4, %v3764_v26  ;;  %v1352_v13 = vsub.f32 %v3625_v30, %v3764_v26 }
 0x358   : > { %v1353_v36 = vsub.f32 %v3671_v51, %v3764_v26  ;;  %v1354_v55 = vsub.f32 %v3651_v45, %v3764_v26  ;;  %v1355_v22 = vsub.f32 %v3695_v54, %v3764_v26  ;;  %v1356_v0 = vsub.f32 %v3677_v16, %v3764_v26 }
 0x359   : > { %v1357_v14 = vsub.f32 %v3711_v50, %v3764_v26  ;;  %v1358_v4 = vsub.f32 %v3705_v53, %v3764_v26  ;;  %v1359_v30 = vsub.f32 %v3731_v11, %v3764_v26  ;;  %v1360_v51 = vsub.f32 %v3725_v9, %v3764_v26 }
 0x35a   : > { %v1362_v45 = vsub.f32 %v3745_v7, %v3764_v26  ;;  %v1363_v52 = vmul.f32 1.442695, %v1347_v5  ;;  %v1365_v54 = vmul.f32 1.442695, %v1348_v18  ;;  %v1367_v38 = vmul.f32 1.442695, %v1349_v1 }
 0x35b   : > { %v1369_v49 = vmul.f32 1.442695, %v1350_v17  ;;  %v1502_v16 = vsub.f32 %v3614_v44, %v3766_v60  ;;  %v1371_v50 = vmul.f32 1.442695, %v1351_v10  ;;  %v1373_v53 = vmul.f32 1.442695, %v1352_v13 }
 0x35c   : > { %2781 = vpow2.f32 %v1363_v52  ;;  %v1503_v11 = vsub.f32 %v3608_v41, %v3766_v60  ;;  %v1504_v46 = vsub.f32 %v3662_v42, %v3766_v60  ;;  %v1505_v15 = vsub.f32 %v3640_v33, %v3766_v60 }
 0x35d   : > { %2783 = vpow2.f32 %v1365_v54  ;;  %v1375_v58 = vmul.f32 1.442695, %v1353_v36  ;;  %v1506_v24 = vsub.f32 %v3637_v39, %v3766_v60  ;;  %v1507_v44 = vsub.f32 %v3628_v56, %v3766_v60 }
 0x35e   : > { %2785 = vpow2.f32 %v1367_v38  ;;  %v1508_v43 = vsub.f32 %v3674_v63, %v3766_v60  ;;  %v1509_v41 = vsub.f32 %v3654_v32, %v3766_v60  ;;  %v1510_v42 = vsub.f32 %v3698_v62, %v3766_v60 }
 0x35f   : > { %2787 = vpow2.f32 %v1369_v49  ;;  %v1511_v33 = vsub.f32 %v3680_v6, %v3766_v60  ;;  %v1512_v29 = vsub.f32 %v3714_v34, %v3766_v60  ;;  %v1513_v39 = vsub.f32 %v3708_v20, %v3766_v60 }
 0x360   : > { %2789 = vpow2.f32 %v1371_v50  ;;  %v1514_v56 = vsub.f32 %v3734_v3, %v3766_v60  ;;  %v1377_v63 = vmul.f32 1.442695, %v1354_v55  ;;  %v1515_v32 = vsub.f32 %v3728_v35, %v3766_v60 }
 0x361   : > { %2791 = vpow2.f32 %v1373_v53  ;;  %v1517_v12 = vsub.f32 %v3748_v57, %v3766_v60  ;;  %v1379_v23 = vmul.f32 1.442695, %v1355_v22  ;;  %v1381_v47 = vmul.f32 1.442695, %v1356_v0 }
 0x362   : > { %2793 = vpow2.f32 %v1375_v58  ;;  %v1383_v40 = vmul.f32 1.442695, %v1357_v14  ;;  %v1518_v5 = vmul.f32 1.442695, %v1502_v16  ;;  %v1520_v17 = vmul.f32 1.442695, %v1503_v11 }
 0x363   : > { %2795 = vpow2.f32 %v1377_v63  ;;  %v1522_v36 = vmul.f32 1.442695, %v1504_v46  ;;  %v1524_v22 = vmul.f32 1.442695, %v1505_v15  ;;  %v1385_v14 = vmul.f32 1.442695, %v1358_v4 }
 0x364   : > { %2797 = vpow2.f32 %v1379_v23  ;;  %v1526_v38 = vmul.f32 1.442695, %v1506_v24  ;;  %v1387_v16 = vmul.f32 1.442695, %v1359_v30  ;;  %v1528_v11 = vmul.f32 1.442695, %v1507_v44 }
 0x365   : > { %2799 = vpow2.f32 %v1381_v47  ;;  %v1389_v4 = vmul.f32 1.442695, %v1360_v51  ;;  %v1530_v30 = vmul.f32 1.442695, %v1508_v43  ;;  %v1391_v63 = vmul.f32 1.442695, %v1361_v27 }
 0x366   : > { %v3832_v25 = vpop.eup %2781  ;;  %2801 = vpow2.f32 %v1383_v40  ;;  %v1532_v51 = vmul.f32 1.442695, %v1509_v41  ;;  %v1393_v43 = vmul.f32 1.442695, %v1362_v45  ;;  %v1534_v27 = vmul.f32 1.442695, %v1510_v42 }
 0x367   : > { %v3834_v19 = vpop.eup %2783  ;;  %v1395_v31 = vsel %vm592_vm1, %v3832_v25, 0.0  ;;  %2803 = vpow2.f32 %v1518_v5  ;;  %v1536_v26 = vmul.f32 1.442695, %v1511_v33  ;;  %v1538_v6 = vmul.f32 1.442695, %v1512_v29 }
 0x368   : > { %v3838_v18 = vpop.eup %2785  ;;  %v1396_v1 = vsel %vm592_vm1, %v3834_v19, 0.0  ;;  %2805 = vpow2.f32 %v1520_v17  ;;  %v1548_v21 = vmul.f32 1.442695, %v1517_v12 }
 0x369   : > { %v3842_v10 = vpop.eup %2787  ;;  %v1397_v13 = vadd.f32 %v1396_v1, %v1395_v31  ;;  %v1398_v55 = vsel %vm592_vm1, %v3838_v18, 0.0  ;;  %2807 = vpow2.f32 %v1522_v36 }
 0x36a   : > { %v3846_v0 = vpop.eup %2789  ;;  %v1400_v54 = vsel %vm592_vm1, %v3842_v10, 0.0  ;;  %2809 = vpow2.f32 %v1524_v22 }
 0x36b   : > { %v1399_v52 = vadd.f32 %v1398_v55, %v1397_v13  ;;  %v3850_v49 = vpop.eup %2791  ;;  %v1402_v53 = vsel %vm592_vm1, %v3846_v0, 0.0  ;;  %2811 = vpow2.f32 %v1385_v14 }
 0x36c   : > { %v3854_v46 = vpop.eup %2793  ;;  %v1404_v58 = vsel %vm592_vm1, %v3850_v49, 0.0  ;;  %2813 = vpow2.f32 %v1526_v38  ;;  %v1540_v38 = vmul.f32 1.442695, %v1513_v39 }
 0x36d   : > { %v1401_v50 = vadd.f32 %v1400_v54, %v1399_v52  ;;  %v3861_v24 = vpop.eup %2795  ;;  %2815 = vpow2.f32 %v1387_v16  ;;  %v1406_v9 = vsel %vm592_vm1, %v3854_v46, 0.0 }
 0x36e   : > { %v3866_v23 = vpop.eup %2797  ;;  %2817 = vpow2.f32 %v1528_v11  ;;  %v1408_v28 = vsel %vm592_vm1, %v3861_v24, 0.0 }
 0x36f   : > { %v1403_v15 = vadd.f32 %v1402_v53, %v1401_v50  ;;  %v3870_v47 = vpop.eup %2799  ;;  %2819 = vpow2.f32 %v1389_v4  ;;  %v1410_v7 = vsel %vm592_vm1, %v3866_v23, 0.0  ;;  %v1542_v4 = vmul.f32 1.442695, %v1514_v56 }
 0x370   : > { %v3875_v31 = vpop.eup %2801  ;;  %2821 = vpow2.f32 %v1530_v30  ;;  %v1412_v36 = vsel %vm592_vm1, %v3870_v47, 0.0 }
 0x371   : > { %v1405_v44 = vadd.f32 %v1404_v58, %v1403_v15  ;;  %v3882_v5 = vpop.eup %2803  ;;  %2823 = vpow2.f32 %v1391_v63  ;;  %v1414_v54 = vsel %vm592_vm1, %v3875_v31, 0.0 }
 0x372   : > { %v3884_v1 = vpop.eup %2805  ;;  %2825 = vpow2.f32 %v1532_v51  ;;  %v1550_v45 = vsel %vm592_vm1, %v3882_v5, 0.0 }
 0x373   : > { %v1407_v40 = vadd.f32 %v1406_v9, %v1405_v44  ;;  %v3893_v17 = vpop.eup %2807  ;;  %2827 = vpow2.f32 %v1393_v43  ;;  %v1551_v42 = vsel %vm592_vm1, %v3884_v1, 0.0  ;;  %v1544_v44 = vmul.f32 1.442695, %v1515_v32 }
 0x374   : > { %v3897_v13 = vpop.eup %2809  ;;  %2829 = vpow2.f32 %v1534_v27  ;;  %v1552_v33 = vadd.f32 %v1551_v42, %v1550_v45  ;;  %v1553_v14 = vsel %vm592_vm1, %v3893_v17, 0.0 }
 0x375   : > { %v1409_v41 = vadd.f32 %v1408_v28, %v1407_v40  ;;  %v3904_v55 = vpop.eup %2811  ;;  %2831 = vpow2.f32 %v1536_v26  ;;  %v1555_v50 = vsel %vm592_vm1, %v3897_v13, 0.0  ;;  %v1546_v40 = vmul.f32 1.442695, %v1516_v48 }
 0x376   : > { %v3908_v52 = vpop.eup %2813  ;;  %v1554_v16 = vadd.f32 %v1553_v14, %v1552_v33  ;;  %v1416_v11 = vsel %vm592_vm1, %v3904_v55, 0.0  ;;  %2833 = vpow2.f32 %v1538_v6 }
 0x377   : > { %v1411_v62 = vadd.f32 %v1410_v7, %v1409_v41  ;;  %v3915_v34 = vpop.eup %2815  ;;  %v1557_v58 = vsel %vm592_vm1, %v3908_v52, 0.0  ;;  %2835 = vpow2.f32 %v1540_v38 }
 0x378   : > { %v3919_v53 = vpop.eup %2817  ;;  %v1556_v15 = vadd.f32 %v1555_v50, %v1554_v16  ;;  %v1418_v63 = vsel %vm592_vm1, %v3915_v34, 0.0  ;;  %2837 = vpow2.f32 %v1542_v4 }
 0x379   : > { %v1413_v22 = vadd.f32 %v1412_v36, %v1411_v62  ;;  %v3926_v20 = vpop.eup %2819  ;;  %v1559_v51 = vsel %vm592_vm1, %v3919_v53, 0.0  ;;  %2839 = vpow2.f32 %v1544_v44 }
 0x37a   : > { %v3930_v30 = vpop.eup %2821  ;;  %v1558_v9 = vadd.f32 %v1557_v58, %v1556_v15  ;;  %v1420_v28 = vsel %vm592_vm1, %v3926_v20, 0.0  ;;  %2841 = vpow2.f32 %v1546_v40 }
 0x37b   : > { %v1415_v29 = vadd.f32 %v1414_v54, %v1413_v22  ;;  %v3937_v3 = vpop.eup %2823  ;;  %v1561_v41 = vsel %vm592_vm1, %v3930_v30, 0.0  ;;  %2843 = vpow2.f32 %v1548_v21 }
 0x37c   : > { %v3941_v43 = vpop.eup %2825  ;;  %v1560_v27 = vadd.f32 %v1559_v51, %v1558_v9  ;;  %v1422_v26 = vsel %vm592_vm1, %v3937_v3, 0.0 }
 0x37d   : > { %v1417_v39 = vadd.f32 %v1416_v11, %v1415_v29  ;;  %v3948_v35 = vpop.eup %2827  ;;  %v1563_v62 = vsel %vm592_vm1, %v3941_v43, 0.0 }
 0x37e   : > { %v3952_v7 = vpop.eup %2829  ;;  %v1562_v48 = vadd.f32 %v1561_v41, %v1560_v27  ;;  %v1424_v36 = vsel %vm619_vm2, %v3948_v35, 0.0 }
 0x37f   : > { %v1419_v56 = vadd.f32 %v1418_v63, %v1417_v39  ;;  %v3961_v42 = vpop.eup %2831  ;;  %v1565_v22 = vsel %vm592_vm1, %v3952_v7, 0.0 }
 0x380   : > { %v1564_v6 = vadd.f32 %v1563_v62, %v1562_v48  ;;  %v3967_v14 = vpop.eup %2833  ;;  %v1567_v12 = vsel %vm592_vm1, %v3961_v42, 0.0 }
 0x381   : > { %v1421_v32 = vadd.f32 %v1420_v28, %v1419_v56  ;;  %v3971_v54 = vpop.eup %2835  ;;  %v1569_v29 = vsel %vm592_vm1, %v3967_v14, 0.0 }
 0x382   : > { %v1566_v57 = vadd.f32 %v1565_v22, %v1564_v6  ;;  %v3975_v50 = vpop.eup %2837  ;;  %v1571_v15 = vsel %vm592_vm1, %v3971_v54, 0.0 }
 0x383   : > { %v1423_v45 = vadd.f32 %v1422_v26, %v1421_v32  ;;  %v3979_v39 = vpop.eup %2839  ;;  %v1573_v44 = vsel %vm592_vm1, %v3975_v50, 0.0 }
 0x384   : > { %v1568_v38 = vadd.f32 %v1567_v12, %v1566_v57  ;;  %v3983_v9 = vpop.eup %2841  ;;  %v1575_v40 = vsel %vm592_vm1, %v3979_v39, 0.0 }
 0x385   : > { %v1425_v33 = vadd.f32 %v1424_v36, %v1423_v45  ;;  %v3987_v28 = vpop.eup %2843  ;;  %v1577_v32 = vsel %vm592_vm1, %v3983_v9, 0.0 }
 0x386   : > { %v1570_v11 = vadd.f32 %v1569_v29, %v1568_v38  ;;  %v1579_v21 = vsel %vm619_vm2, %v3987_v28, 0.0 }
 0x387   : > { %v1426_v60 = vrot.slane %v1425_v33, 4 }
 0x388   : > { %v1572_v58 = vadd.f32 %v1571_v15, %v1570_v11 }
 0x389   : > { %v1427_v16 = vadd.f32 %v1426_v60, %v1425_v33 }
 0x38a   : > { %v1574_v56 = vadd.f32 %v1573_v44, %v1572_v58 }
 0x38b   : > { %v1428_v4 = vrot.slane %v1427_v16, 2 }
 0x38c   : > { %v1576_v27 = vadd.f32 %v1575_v40, %v1574_v56 }
 0x38d   : > { %v1429_v63 = vadd.f32 %v1428_v4, %v1427_v16 }
 0x38e   : > { %v1578_v26 = vadd.f32 %v1577_v32, %v1576_v27 }
 0x38f   : > { %v1430_v51 = vrot.slane %v1429_v63, 1 }
 0x390   : > { %v1580_v48 = vadd.f32 %v1579_v21, %v1578_v26 }
 0x391   : > { %v1431_v41 = vadd.f32 %v1430_v51, %v1429_v63 }
 0x392   : > { %v1581_v45 = vrot.slane %v1580_v48, 4 }
 0x393   : > { %2845 = vrcp.f32 %v1431_v41 }
 0x394   : > { %v1582_v62 = vadd.f32 %v1581_v45, %v1580_v48 }
 0x396   : > { %v1583_v36 = vrot.slane %v1582_v62, 2 }
 0x398   : > { %v1584_v6 = vadd.f32 %v1583_v36, %v1582_v62 }
 0x39a   : > { %v1585_v60 = vrot.slane %v1584_v6, 1 }
 0x39c   : > { %v1586_v15 = vadd.f32 %v1585_v60, %v1584_v6  ;;  %v288_v6 = vld [vmem:[%s4160_s3 + $0x20] sm:$0xff]  ;;  %v290_v60 = vld [vmem:[%s4160_s3 + $0x30] sm:$0xff] }
 0x39d   : > { %v2846_v33 = vpop.eup %2845 }
 0x39e   : > { %v1433_v22 = vmul.f32 %v2846_v33, %v3832_v25  ;;  %v1434_v57 = vmul.f32 %v2846_v33, %v3834_v19  ;;  %v1435_v12 = vmul.f32 %v2846_v33, %v3838_v18  ;;  %v1436_v38 = vmul.f32 %v2846_v33, %v3842_v10 }
 0x39f   : > { %v1437_v16 = vmul.f32 %v2846_v33, %v3846_v0  ;;  %v1438_v29 = vmul.f32 %v2846_v33, %v3850_v49  ;;  %v1439_v11 = vmul.f32 %v2846_v33, %v3854_v46  ;;  %v1440_v58 = vmul.f32 %v2846_v33, %v3861_v24 }
 0x3a0   : > { %v2563_v4 = vpack.c.bf16 %v1434_v57, %v1433_v22  ;;  %v1441_v63 = vmul.f32 %v2846_v33, %v3866_v23  ;;  %v2567_v25 = vpack.c.bf16 %v1436_v38, %v1435_v12  ;;  %v1442_v19 = vmul.f32 %v2846_v33, %v3870_v47  ;;  %v2850_v22 = vld [vmem:[%s2946_s29 + $0x8] sm:$0xff]  ;;  %v291_v12 = vld [vmem:[%s4160_s3 + $0x38] sm:$0xff] }
 0x3a1   : > { %v2571_v44 = vpack.c.bf16 %v1438_v29, %v1437_v16  ;;  %v1443_v18 = vmul.f32 %v2846_v33, %v3875_v31  ;;  %2847 = vrcp.f32 %v1586_v15  ;;  %v2575_v10 = vpack.c.bf16 %v1440_v58, %v1439_v11  ;;  %v292_v16 = vld [vmem:[%s4160_s3 + $0x40] sm:$0xff]  ;;  %v293_v29 = vld [vmem:[%s4160_s3 + $0x48] sm:$0xff]  ;;  %v295_v15 = vld [vmem:[%s4160_s3 + $0x58] sm:$0xff] }
 0x3a2   : > { %2564 = vmatprep.subr.bf16.mxu0 %v2563_v4  ;;  %v1444_v0 = vmul.f32 %v2846_v33, %v3904_v55  ;;  %v1445_v49 = vmul.f32 %v2846_v33, %v3915_v34  ;;  %v2579_v46 = vpack.c.bf16 %v1442_v19, %v1441_v63  ;;  %v1446_v56 = vmul.f32 %v2846_v33, %v3926_v20  ;;  %v296_v63 = vld [vmem:[%s4160_s3 + $0x60] sm:$0xff]  ;;  %v298_v19 = vld [vmem:[%s4160_s3 + $0x70] sm:$0xff] }
 0x3a3   : > { %2566 = vmatpush3.bf16.msra.mxu0 %v2563_v4  ;;  %v1447_v24 = vmul.f32 %v2846_v33, %v3937_v3  ;;  %v1448_v23 = vmul.f32 %v2846_v33, %v3948_v35  ;;  %v289_v33 = vld [vmem:[%s4160_s3 + $0x28] sm:$0xff]  ;;  %v2643_v38 = vpack.c.bf16 %v291_v12, %v290_v60  ;;  %v2647_v11 = vpack.c.bf16 %v293_v29, %v292_v16  ;;  %v294_v4 = vld [vmem:[%s4160_s3 + $0x50] sm:$0xff] }
 0x3a4   : > { %2568 = vmatprep.subr.bf16.mxu0 %v2567_v25  ;;  %v2583_v51 = vpack.c.bf16 %v1444_v0, %v1443_v18  ;;  %v2587_v47 = vpack.c.bf16 %v1446_v56, %v1445_v49  ;;  %v2639_v57 = vpack.c.bf16 %v289_v33, %v288_v6  ;;  %v2651_v58 = vpack.c.bf16 %v295_v15, %v294_v4  ;;  %v299_v18 = vld [vmem:[%s4160_s3 + $0x78] sm:$0x1]  ;;  %v268_v0 = vld [vmem:[%s4159_s2] sm:$0xff]  ;;  %v269_v49 = vld [vmem:[%s4159_s2 + $0x8] sm:$0xff] }
 0x3a5   : > { %v2591_v40 = vpack.c.bf16 %v1448_v23, %v1447_v24 }
 0x3a7   : > { %2570 = vmatpush3.bf16.msra.mxu0 %v2567_v25  ;;  %v297_v25 = vld [vmem:[%s4160_s3 + $0x68] sm:$0xff] }
 0x3a8   : > { %2572 = vmatprep.subr.bf16.mxu0 %v2571_v44 }
 0x3ab   : > { %2574 = vmatpush3.bf16.msra.mxu0 %v2571_v44  ;;  %v2848_v31 = vpop.eup %2847  ;;  %v2655_v44 = vpack.c.bf16 %v297_v25, %v296_v63 }
 0x3ac   : > { %2576 = vmatprep.subr.bf16.mxu0 %v2575_v10  ;;  %v1588_v55 = vmul.f32 %v2848_v31, %v3882_v5  ;;  %v1589_v34 = vmul.f32 %v2848_v31, %v3884_v1  ;;  %v1590_v27 = vmul.f32 %v2848_v31, %v3893_v17  ;;  %v1591_v20 = vmul.f32 %v2848_v31, %v3897_v13 }
 0x3ad   : > { %v1592_v3 = vmul.f32 %v2848_v31, %v3908_v52  ;;  %v1593_v35 = vmul.f32 %v2848_v31, %v3919_v53  ;;  %v1594_v32 = vmul.f32 %v2848_v31, %v3930_v30  ;;  %v1595_v41 = vmul.f32 %v2848_v31, %v3941_v43 }
 0x3ae   : > { %v2597_v26 = vpack.c.bf16 %v1589_v34, %v1588_v55  ;;  %v2601_v21 = vpack.c.bf16 %v1591_v20, %v1590_v27  ;;  %v1596_v48 = vmul.f32 %v2848_v31, %v3952_v7  ;;  %v1597_v5 = vmul.f32 %v2848_v31, %v3961_v42 }
 0x3af   : > { %2578 = vmatpush3.bf16.msra.mxu0 %v2575_v10  ;;  %v2605_v1 = vpack.c.bf16 %v1593_v35, %v1592_v3  ;;  %v2609_v45 = vpack.c.bf16 %v1595_v41, %v1594_v32  ;;  %v1598_v17 = vmul.f32 %v2848_v31, %v3967_v14  ;;  %v1599_v13 = vmul.f32 %v2848_v31, %v3971_v54  ;;  %v284_v14 = vld [vmem:[%s4160_s3] sm:$0xff]  ;;  %v285_v54 = vld [vmem:[%s4160_s3 + $0x8] sm:$0xff]  ;;  %v275_v3 = vld [vmem:[%s4159_s2 + $0x38] sm:$0xff] }
 0x3b0   : > { %2580 = vmatprep.subr.bf16.mxu0 %v2579_v46  ;;  %2598 = vmatprep.subr.bf16.mxu1 %v2597_v26  ;;  %v2613_v52 = vpack.c.bf16 %v1597_v5, %v1596_v48  ;;  %v1600_v53 = vmul.f32 %v2848_v31, %v3975_v50  ;;  %v1601_v30 = vmul.f32 %v2848_v31, %v3979_v39  ;;  %v286_v39 = vld [vmem:[%s4160_s3 + $0x10] sm:$0xff]  ;;  %v276_v32 = vld [vmem:[%s4159_s2 + $0x40] sm:$0xff]  ;;  %v277_v41 = vld [vmem:[%s4159_s2 + $0x48] sm:$0xff] }
 0x3b1   : > { %v1602_v43 = vmul.f32 %v2848_v31, %v3983_v9  ;;  %2600 = vmatpush3.bf16.msra.mxu1 %v2597_v26  ;;  %v2617_v62 = vpack.c.bf16 %v1599_v13, %v1598_v17  ;;  %v1603_v7 = vmul.f32 %v2848_v31, %v3987_v28  ;;  %v2631_v50 = vpack.c.bf16 %v285_v54, %v284_v14  ;;  %v287_v9 = vld [vmem:[%s4160_s3 + $0x18] sm:$0xff]  ;;  %v282_v13 = vld [vmem:[%s4159_s2 + $0x70] sm:$0xff] }
 0x3b2   : > { %2602 = vmatprep.subr.bf16.mxu1 %v2601_v21  ;;  %v2621_v42 = vpack.c.bf16 %v1601_v30, %v1600_v53  ;;  %v2635_v28 = vpack.c.bf16 %v287_v9, %v286_v39  ;;  %v2659_v10 = vpack.c.bf16 %v299_v18, %v298_v19  ;;  %v271_v31 = vld [vmem:[%s4159_s2 + $0x18] sm:$0xff]  ;;  %v2681_v26 = vpack.c.bf16 %v277_v41, %v276_v32 }
 0x3b3   : > { %2582 = vmatpush3.bf16.msra.mxu0 %v2579_v46  ;;  %v2625_v36 = vpack.c.bf16 %v1603_v7, %v1602_v43  ;;  %v2665_v46 = vpack.c.bf16 %v269_v49, %v268_v0  ;;  %v279_v48 = vld [vmem:[%s4159_s2 + $0x58] sm:$0xff] }
 0x3b4   : > { %2584 = vmatprep.subr.bf16.mxu0 %v2583_v51 }
 0x3b5   : > { %2604 = vmatpush3.bf16.msra.mxu1 %v2601_v21  ;;  %v278_v21 = vld [vmem:[%s4159_s2 + $0x50] sm:$0xff] }
 0x3b6   : > { %2606 = vmatprep.subr.bf16.mxu1 %v2605_v1  ;;  %v2685_v5 = vpack.c.bf16 %v279_v48, %v278_v21 }
 0x3b7   : > { %2586 = vmatpush3.bf16.msra.mxu0 %v2583_v51 }
 0x3b8   : > { %2588 = vmatprep.subr.bf16.mxu0 %v2587_v47 }
 0x3b9   : > { %2608 = vmatpush3.bf16.msra.mxu1 %v2605_v1  ;;  %v280_v1 = vld [vmem:[%s4159_s2 + $0x60] sm:$0xff] }
 0x3ba   : > { %2610 = vmatprep.subr.bf16.mxu1 %v2609_v45 }
 0x3bb   : > { %2590 = vmatpush3.bf16.msra.mxu0 %v2587_v47 }
 0x3bc   : > { %2593 = vmatprep.subr.msk.bf16.mxu0 %vm3555_vm5, %v2591_v40 }
 0x3bd   : > { %2612 = vmatpush3.bf16.msra.mxu1 %v2609_v45  ;;  %v281_v45 = vld [vmem:[%s4159_s2 + $0x68] sm:$0xff] }
 0x3be   : > { %2614 = vmatprep.subr.bf16.mxu1 %v2613_v52  ;;  %v2689_v17 = vpack.c.bf16 %v281_v45, %v280_v1 }
 0x3bf   : > { %2596 = vmatpush3.bf16.msk.msra.mxu0 %vm3555_vm5, %v2591_v40  ;;  %v270_v40 = vld [vmem:[%s4159_s2 + $0x10] sm:$0xff] }
 0x3c0   : > { %2632 = vmatprep.subr.bf16.mxu0 %v2631_v50  ;;  %v2669_v20 = vpack.c.bf16 %v271_v31, %v270_v40 }
 0x3c1   : > { %2616 = vmatpush3.bf16.msra.mxu1 %v2613_v52  ;;  %v283_v52 = vld [vmem:[%s4159_s2 + $0x78] sm:$0x1] }
 0x3c2   : > { %2380 = vmatmul.mubr.msk.f32.vlgmr.msra.gmra.mrb[16].mxu0 %vm592_vm1, %v2850_v22  ;;  %2618 = vmatprep.subr.bf16.mxu1 %v2617_v62  ;;  %v2693_v53 = vpack.c.bf16 %v283_v52, %v282_v13 }
 0x3c3   : > { %2634 = vmatpush3.bf16.msra.mxu0 %v2631_v50 }
 0x3c4   : > { %2636 = vmatprep.subr.bf16.mxu0 %v2635_v28 }
 0x3c5   : > { %2620 = vmatpush3.bf16.msra.mxu1 %v2617_v62 }
 0x3c6   : > { %2622 = vmatprep.subr.bf16.mxu1 %v2621_v42 }
 0x3c7   : > { %2638 = vmatpush3.bf16.msra.mxu0 %v2635_v28 }
 0x3c8   : > { %2640 = vmatprep.subr.bf16.mxu0 %v2639_v57 }
 0x3c9   : > { %2624 = vmatpush3.bf16.msra.mxu1 %v2621_v42 }
 0x3ca   : > { %2627 = vmatprep.subr.msk.bf16.mxu1 %vm3555_vm5, %v2625_v36 }
 0x3cb   : > { %2642 = vmatpush3.bf16.msra.mxu0 %v2639_v57 }
 0x3cc   : > { %2644 = vmatprep.subr.bf16.mxu0 %v2643_v38 }
 0x3cd   : > { %2630 = vmatpush3.bf16.msk.msra.mxu1 %vm3555_vm5, %v2625_v36 }
 0x3cf   : > { %2646 = vmatpush3.bf16.msra.mxu0 %v2643_v38 }
 0x3d0   : > { %2648 = vmatprep.subr.bf16.mxu0 %v2647_v11  ;;  %2415 = vmatmul.mubr.msk.f32.vlgmr.msra.gmra.mrb[20].mxu1 %vm592_vm1, %v2850_v22 }
 0x3d3   : > { %2650 = vmatpush3.bf16.msra.mxu0 %v2647_v11 }
 0x3d4   : > { %2652 = vmatprep.subr.bf16.mxu0 %v2651_v58 }
 0x3d7   : > { %2654 = vmatpush3.bf16.msra.mxu0 %v2651_v58 }
 0x3d8   : > { %2656 = vmatprep.subr.bf16.mxu0 %v2655_v44 }
 0x3db   : > { %2658 = vmatpush3.bf16.msra.mxu0 %v2655_v44 }
 0x3dc   : > { %2661 = vmatprep.subr.msk.bf16.mxu0 %vm3555_vm5, %v2659_v10 }
 0x3df   : > { %2664 = vmatpush3.bf16.msk.msra.mxu0 %vm3555_vm5, %v2659_v10 }
 0x3e0   : > { %2666 = vmatprep.subr.bf16.mxu0 %v2665_v46 }
 0x495   : > { %v2381_v56 = vpop.f32.mrb[16].mxu0 }
 0x496   : > { %v1767_v24 = vsub.f32 %v3596_v37, %v2381_v56  ;;  %v1679_v23 = vpop.f32.mrb[17].mxu0  ;;  %v272_v37 = vld [vmem:[%s4159_s2 + $0x20] sm:$0xff] }
 0x497   : > { %v1766_v51 = vsub.f32 %v3598_v59, %v1679_v23  ;;  %v273_v59 = vld [vmem:[%s4159_s2 + $0x28] sm:$0xff] }
 0x4a3   : > { %v2416_v47 = vpop.f32.mrb[20].mxu1 }
 0x4a4   : > { %v1769_v55 = vsub.f32 %v3600_v2, %v2416_v47  ;;  %v1757_v34 = vpop.f32.mrb[21].mxu1  ;;  %v2673_v2 = vpack.c.bf16 %v273_v59, %v272_v37 }
 0x4a5   : > { %v1768_v27 = vsub.f32 %v3602_v8, %v1757_v34  ;;  %v274_v8 = vld [vmem:[%s4159_s2 + $0x30] sm:$0xff] }
 0x4a6   : > { %v2677_v35 = vpack.c.bf16 %v275_v3, %v274_v8 }
 0x4a7   : > { %2449 = vmatprep.mubr.msk.f32.mxu0 %vm592_vm1, %v1768_v27 }
 0x4a8   : > { %2450 = vmatmul.mubr.msk.f32.vlgmr.msra.gmra.mrb[18].mxu0 %vm592_vm1, %v1769_v55 }
 0x4a9   : > { %2668 = vmatpush3.bf16.msra.mxu0 %v2665_v46  ;;  %2484 = vmatprep.mubr.msk.f32.mxu0 %vm592_vm1, %v1766_v51 }
 0x4aa   : > { %2670 = vmatprep.subr.bf16.mxu0 %v2669_v20 }
 0x4ad   : > { %2672 = vmatpush3.bf16.msra.mxu0 %v2669_v20 }
 0x4ae   : > { %2674 = vmatprep.subr.bf16.mxu0 %v2673_v2 }
 0x4b1   : > { %2676 = vmatpush3.bf16.msra.mxu0 %v2673_v2 }
 0x4b2   : > { %2678 = vmatprep.subr.bf16.mxu0 %v2677_v35 }
 0x4b5   : > { %2680 = vmatpush3.bf16.msra.mxu0 %v2677_v35 }
 0x4b6   : > { %2682 = vmatprep.subr.bf16.mxu0 %v2681_v26 }
 0x4b9   : > { %2684 = vmatpush3.bf16.msra.mxu0 %v2681_v26 }
 0x4ba   : > { %2686 = vmatprep.subr.bf16.mxu0 %v2685_v5 }
 0x4bd   : > { %2688 = vmatpush3.bf16.msra.mxu0 %v2685_v5 }
 0x4be   : > { %2690 = vmatprep.subr.bf16.mxu0 %v2689_v17 }
 0x4c1   : > { %2692 = vmatpush3.bf16.msra.mxu0 %v2689_v17 }
 0x4c2   : > { %2695 = vmatprep.subr.msk.bf16.mxu0 %vm3555_vm5, %v2693_v53 }
 0x4c5   : > { %2698 = vmatpush3.bf16.msk.msra.mxu0 %vm3555_vm5, %v2693_v53 }
 0x4c8   : > { %2485 = vmatmul.mubr.msk.f32.vlgmr.msra.gmra.mrb[18].mxu0 %vm592_vm1, %v1767_v24 }
 0x59b   : > { %v2486_v30 = vpop.f32.mrb[18].mxu0 }
 0x59c   : > { %v1939_v43 = vand.u32 2147483647, %v2486_v30  ;;  %v1929_v62 = vpop.f32.mrb[19].mxu0 }
 0x59d   : > { %v1938_v7 = vand.u32 2147483647, %v1929_v62 }
 0x59e   : > { %v1941_v42 = vsel %vm592_vm1, %v1939_v43, 0.0 }
 0x59f   : > { %v1940_v36 = vsel %vm592_vm1, %v1938_v7, 0.0 }
 0x5a0   : > { %v1942_v14 = vadd.f32 %v1941_v42, %v1940_v36 }
 0x5a2   : > { %1943 = vadd.xlane.f32.xlu0 %v1942_v14 }
 0x62f   : > { %v1944_v54 = vpop.xlane.xlu0 %1943 }
 0x630   : > { %v1945_v50 = vrot.slane %v1944_v54, 4 }
 0x632   : > { %v1946_v39 = vadd.f32 %v1945_v50, %v1944_v54 }
 0x634   : > { %v1947_v9 = vrot.slane %v1946_v39, 2 }
 0x636   : > { %v1948_v28 = vadd.f32 %v1947_v9, %v1946_v39 }
 0x638   : > { %v1949_v61 = vrot.slane %v1948_v28, 1 }
 0x63a   : > { %v1950_v6 = vadd.f32 %v1949_v61, %v1948_v28 }
 0x63c   : > { %2701 = vpush %v1950_v6 }
 0x66d   : > { %s2702_s10 = spop %2701 }
 0x66e   : > { %v1952_v33 = vstv %s2702_s10 }
 0x66f   : > { %1954 = vst.msk [vmem:[%s267_s26] sm:$0x1] %vm1953_vm6, %v1952_v33 }
 0x670 PF: > { %s16_s21 = sadd.s32 1, %s2857_s21  }
 0x671   : > { %p13_p4 = scmp.ge.s32.totalorder %s16_s21, 4  }
 0x673   :  { %15 = sbr.rel (!%p13_p4) target bundleno = 1 (0x1), region = 77 }

</bundles_post_ra>
